<compile_context>
chip_gen: v7x
topology: tpu7x:2x2x1
jax: 0.10.0
libtpu: 0.0.40
codegen_flags: <defaults>
</compile_context>

<pallas_src>
import math

import jax
import jax.numpy as jnp
import numpy as np
from jax.experimental import pallas as pl
from jax.experimental.pallas import tpu as pltpu

d_k = d_v = 64
d_model = 192
n_heads = 8
LN_EPS = 1e-5
NEG_INF = -1e9


# ---------------------------------------------------------------------------
# Fused multi-head-attention kernel (one batch-block per grid step)
# ---------------------------------------------------------------------------
def mha_kernel(xq_ref, xk_ref, xv_ref, bias_ref,
               wq_ref, wk_ref, wv_ref, wo_ref, gamma_ref, beta_ref,
               out_ref, attn_ref, ctx_ref):
    bb, Sq, D = xq_ref.shape
    Sk = xk_ref.shape[1]
    H = wq_ref.shape[1] // d_k

    xq = xq_ref[...]                                       # (bb,Sq,D) f32 (residual)
    xq_rows = xq.reshape(bb * Sq, D)
    xq_b = xq_rows.astype(jnp.bfloat16)
    xk_b = xk_ref[...].reshape(bb * Sk, D).astype(jnp.bfloat16)
    xv_b = xv_ref[...].reshape(bb * Sk, D).astype(jnp.bfloat16)
    bias = bias_ref[...]                                   # (bb,Sq,Sk) f32, 0 / -1e9

    # 1) full-width projections: three lane-dense MXU matmuls, bf16 operands,
    #    f32 accumulation.  1/sqrt(d_k) is already folded into wq.
    q = jnp.dot(xq_b, wq_ref[...], preferred_element_type=jnp.float32)  # (bb*Sq, H*dk)
    k = jnp.dot(xk_b, wk_ref[...], preferred_element_type=jnp.float32)  # (bb*Sk, H*dk)
    v = jnp.dot(xv_b, wv_ref[...], preferred_element_type=jnp.float32)  # (bb*Sk, H*dv)
    q = q.astype(jnp.bfloat16)
    k = k.astype(jnp.bfloat16)
    v = v.astype(jnp.bfloat16)

    # 2) per-head attention core.  Heads are static lane slices of the packed
    #    projection results; contexts are packed lane-dense into the VMEM
    #    scratch so the output projection is a single full-K matmul.
    for h in range(H):
        qh = q[:, h * d_k:(h + 1) * d_k].reshape(bb, Sq, d_k)
        kh = k[:, h * d_k:(h + 1) * d_k].reshape(bb, Sk, d_k)
        vh = v[:, h * d_v:(h + 1) * d_v].reshape(bb, Sk, d_v)

        scores = jnp.einsum("bqd,bkd->bqk", qh, kh,
                            preferred_element_type=jnp.float32) + bias   # (bb,Sq,Sk)
        m = jnp.max(scores, axis=-1, keepdims=True)
        e = jnp.exp(scores - m)
        denom = jnp.sum(e, axis=-1, keepdims=True)
        attn = e * pl.reciprocal(denom, approx=True)                      # f32

        # lane-dense bf16 attention slab (all heads packed along the last dim)
        attn_ref[:, :, h * Sk:(h + 1) * Sk] = attn.astype(attn_ref.dtype)

        ctx = jnp.einsum("bqk,bkd->bqd", attn.astype(jnp.bfloat16), vh,
                         preferred_element_type=jnp.float32)              # (bb,Sq,dv)
        ctx_ref[:, h * d_v:(h + 1) * d_v] = (
            ctx.reshape(bb * Sq, d_v).astype(ctx_ref.dtype))

    # 3) single output projection over the lane-dense packed contexts
    out = jnp.dot(ctx_ref[...], wo_ref[...], preferred_element_type=jnp.float32)

    # 4) residual + LayerNorm (f32)
    out = out + xq_rows
    mean = jnp.mean(out, axis=-1, keepdims=True)
    var = jnp.mean((out - mean) ** 2, axis=-1, keepdims=True)
    normed = (out - mean) * jax.lax.rsqrt(var + LN_EPS)
    out_ref[...] = (normed * gamma_ref[...] + beta_ref[...]).reshape(bb, Sq, D)


# ---------------------------------------------------------------------------
# Wrapper
# ---------------------------------------------------------------------------
def prepare_mha_params(params):
    """One-time weight preparation (hoisted out of the forward path)."""
    scale = 1.0 / math.sqrt(d_k)
    return dict(
        wq=(params["wq"] * scale).astype(jnp.bfloat16),    # (D, H*dk), scale folded
        wk=params["wk"].astype(jnp.bfloat16),              # (D, H*dk)
        wv=params["wv"].astype(jnp.bfloat16),              # (D, H*dv)
        wo=params["wo"].astype(jnp.bfloat16),              # (H*dv, D)
        gamma=params["gamma"].reshape(1, d_model).astype(jnp.float32),
        beta=params["beta"].reshape(1, d_model).astype(jnp.float32),
    )


def multi_head_attention(input_q, input_k, input_v, attn_mask, prepared,
                         *, batch_block=None):
    """Fused MHA. Returns (output [B,Sq,d_model], attn [B,H,Sq,Sk])."""
    B, Sq, D = input_q.shape
    Sk = input_k.shape[1]
    if batch_block is None:
        # grid >= 2 when B allows: feeds both v7x TensorCores and lets the
        # BlockSpec pipeline double-buffer input/output DMA against compute.
        batch_block = 1 if B == 1 else max(
            d for d in range(1, B // 2 + 1) if B % d == 0)
    assert B % batch_block == 0
    nb = B // batch_block

    # additive mask bias, computed once outside the head loop.
    # (fully-masked rows give softmax(raw scores) instead of uniform 1/Sk;
    #  both are degenerate, identical otherwise.)
    bias = jnp.where(attn_mask.astype(jnp.bool_),
                     jnp.float32(NEG_INF), jnp.float32(0.0))

    Hdk = n_heads * d_k
    Hdv = n_heads * d_v

    # advisory cost estimate for the XLA scheduler
    flops = (2 * B * Sq * D * Hdk + 2 * B * Sk * D * Hdk + 2 * B * Sk * D * Hdv
             + 2 * B * n_heads * Sq * Sk * d_k
             + 2 * B * n_heads * Sq * Sk * d_v
             + 2 * B * Sq * Hdv * D)
    transcendentals = B * n_heads * Sq * Sk
    bytes_accessed = (4 * (2 * B * Sq * D + 2 * B * Sk * D + B * Sq * Sk)
                      + 2 * B * Sq * n_heads * Sk
                      + 2 * (2 * D * Hdk + D * Hdv + Hdv * D) + 8 * D)

    # rough VMEM budget: 2x double-buffered I/O blocks + weights + scratch,
    # x4 for layout padding; clamp to [32 MiB, 48 MiB] (48 MiB safe on v7x).
    blk_io = (4 * (2 * batch_block * Sq * D + 2 * batch_block * Sk * D
                   + batch_block * Sq * Sk)
              + 2 * batch_block * Sq * n_heads * Sk)
    blk_w = 2 * (2 * D * Hdk + D * Hdv + Hdv * D) + 8 * D
    blk_scratch = 2 * batch_block * Sq * Hdv
    vmem_limit = int(min(max(4 * (2 * blk_io + blk_w + blk_scratch),
                             32 * 1024 * 1024), 48 * 1024 * 1024))

    grid_spec = pltpu.PrefetchScalarGridSpec(
        num_scalar_prefetch=0,
        grid=(nb,),
        in_specs=[
            pl.BlockSpec((batch_block, Sq, D), lambda b: (b, 0, 0)),
            pl.BlockSpec((batch_block, Sk, D), lambda b: (b, 0, 0)),
            pl.BlockSpec((batch_block, Sk, D), lambda b: (b, 0, 0)),
            pl.BlockSpec((batch_block, Sq, Sk), lambda b: (b, 0, 0)),
            pl.BlockSpec((D, Hdk), lambda b: (0, 0)),
            pl.BlockSpec((D, Hdk), lambda b: (0, 0)),
            pl.BlockSpec((D, Hdv), lambda b: (0, 0)),
            pl.BlockSpec((Hdv, D), lambda b: (0, 0)),
            pl.BlockSpec((1, D), lambda b: (0, 0)),
            pl.BlockSpec((1, D), lambda b: (0, 0)),
        ],
        out_specs=[
            pl.BlockSpec((batch_block, Sq, D), lambda b: (b, 0, 0)),
            pl.BlockSpec((batch_block, Sq, n_heads * Sk), lambda b: (b, 0, 0)),
        ],
        scratch_shapes=[pltpu.VMEM((batch_block * Sq, Hdv), jnp.bfloat16)],
    )

    out, attn_slab = pl.pallas_call(
        mha_kernel,
        out_shape=(
            jax.ShapeDtypeStruct((B, Sq, D), jnp.float32),
            jax.ShapeDtypeStruct((B, Sq, n_heads * Sk), jnp.bfloat16),
        ),
        grid_spec=grid_spec,
        compiler_params=pltpu.CompilerParams(
            dimension_semantics=("parallel",),
            vmem_limit_bytes=vmem_limit),
        cost_estimate=pl.CostEstimate(flops=flops,
                                      transcendentals=transcendentals,
                                      bytes_accessed=bytes_accessed),
    )(input_q, input_k, input_v, bias,
      prepared["wq"], prepared["wk"], prepared["wv"], prepared["wo"],
      prepared["gamma"], prepared["beta"])

    # (B, Sq, H*Sk) bf16 slab -> f32 (B, H, Sq, Sk) in the wrapper
    attn = (attn_slab.astype(jnp.float32)
            .reshape(B, Sq, n_heads, Sk).transpose(0, 2, 1, 3))
    return out, attn


# ---------------------------------------------------------------------------
# Parameter construction (deterministic, synthetic)
# ---------------------------------------------------------------------------
def init_mha_params(key):
    k1, k2, k3, k4 = jax.random.split(key, 4)
    s = 1.0 / math.sqrt(d_model)
    return dict(
        wq=jax.random.normal(k1, (d_model, n_heads * d_k), jnp.float32) * s,
        wk=jax.random.normal(k2, (d_model, n_heads * d_k), jnp.float32) * s,
        wv=jax.random.normal(k3, (d_model, n_heads * d_v), jnp.float32) * s,
        wo=jax.random.normal(k4, (n_heads * d_v, d_model), jnp.float32)
        * (1.0 / math.sqrt(n_heads * d_v)),
        gamma=jnp.ones((1, d_model), jnp.float32),
        beta=jnp.zeros((1, d_model), jnp.float32),
    )


# ---------------------------------------------------------------------------
# Pure-JAX f32 reference (mirrors the PyTorch module exactly)
# ---------------------------------------------------------------------------
def _mha_ref(input_q, input_k, input_v, attn_mask, p):
    B, Sq, _ = input_q.shape
    Sk = input_k.shape[1]
    q = (input_q @ p["wq"]).reshape(B, Sq, n_heads, d_k).transpose(0, 2, 1, 3)
    k = (input_k @ p["wk"]).reshape(B, Sk, n_heads, d_k).transpose(0, 2, 1, 3)
    v = (input_v @ p["wv"]).reshape(B, Sk, n_heads, d_v).transpose(0, 2, 1, 3)
    scores = jnp.einsum("bhqd,bhkd->bhqk", q, k) / np.sqrt(d_k)
    scores = jnp.where(attn_mask[:, None, :, :] > 0.5, -1e9, scores)
    attn = jax.nn.softmax(scores, axis=-1)
    ctx = jnp.einsum("bhqk,bhkd->bhqd", attn, v)
    ctx = ctx.transpose(0, 2, 1, 3).reshape(B, Sq, n_heads * d_v)
    out = ctx @ p["wo"] + input_q
    mean = out.mean(-1, keepdims=True)
    var = ((out - mean) ** 2).mean(-1, keepdims=True)
    out = (out - mean) / jnp.sqrt(var + LN_EPS) * p["gamma"] + p["beta"]
    return out, attn


if __name__ == "__main__":
    key = jax.random.PRNGKey(0)
    k_q, k_kv, k_p = jax.random.split(key, 3)

    B, Sq, Sk = 2, 8, 16
    params = init_mha_params(k_p)
    prepared = prepare_mha_params(params)   # one-time weight prep (hoisted)

    x = jax.random.normal(k_q, (B, Sq, d_model), jnp.float32)      # queries / residual
    enc = jax.random.normal(k_kv, (B, Sk, d_model), jnp.float32)   # cross-attn K/V

    # Case 1: causal self-attention (True == masked), K = V = Q input
    causal = jnp.triu(jnp.ones((Sq, Sq), jnp.float32), k=1) > 0.5
    self_mask = jnp.broadcast_to(causal, (B, Sq, Sq))
    out1, attn1 = multi_head_attention(x, x, x, self_mask, prepared)

    # Case 2: unmasked cross-attention with a longer key/value sequence
    cross_mask = jnp.zeros((B, Sq, Sk), jnp.bool_)
    out2, attn2 = multi_head_attention(x, enc, enc, cross_mask, prepared)

    jax.block_until_ready((out1, attn1, out2, attn2))

    # correctness vs. f32 reference (bf16 matmul operands / bf16 attn slab -> loose tol)
    ref1, refa1 = _mha_ref(x, x, x, self_mask, params)
    ref2, refa2 = _mha_ref(x, enc, enc, cross_mask, params)
    np.testing.assert_allclose(np.asarray(out1), np.asarray(ref1), rtol=5e-2, atol=5e-2)
    np.testing.assert_allclose(np.asarray(attn1), np.asarray(refa1), rtol=5e-2, atol=2e-2)
    np.testing.assert_allclose(np.asarray(out2), np.asarray(ref2), rtol=5e-2, atol=5e-2)
    np.testing.assert_allclose(np.asarray(attn2), np.asarray(refa2), rtol=5e-2, atol=2e-2)

    print("KERNEL_OK")
</pallas_src>

<mosaic_0001>
module attributes {stable_mosaic.version = 11 : i64} {
  func.func @mha_kernel(%arg0: i32, %arg1: memref<1x8x192xf32, #tpu.memory_space<vmem>>, %arg2: memref<1x8x192xf32, #tpu.memory_space<vmem>>, %arg3: memref<1x8x192xf32, #tpu.memory_space<vmem>>, %arg4: memref<1x8x8xf32, #tpu.memory_space<vmem>>, %arg5: memref<192x512xbf16, #tpu.memory_space<vmem>>, %arg6: memref<192x512xbf16, #tpu.memory_space<vmem>>, %arg7: memref<192x512xbf16, #tpu.memory_space<vmem>>, %arg8: memref<512x192xbf16, #tpu.memory_space<vmem>>, %arg9: memref<1x192xf32, #tpu.memory_space<vmem>>, %arg10: memref<1x192xf32, #tpu.memory_space<vmem>>, %arg11: memref<1x8x192xf32, #tpu.memory_space<vmem>>, %arg12: memref<1x8x64xbf16, #tpu.memory_space<vmem>>, %arg13: memref<8x512xbf16, #tpu.memory_space<vmem>>) attributes {dimension_semantics = [#tpu.dimension_semantics<parallel>], iteration_bounds = array<i64: 2>, scalar_prefetch = 0 : i64, scratch_operands = 1 : i64, tpu.core_type = #tpu.core_type<tc>, window_params = [{transform_indices = @transform_0, window_bounds = array<i64: 1, 8, 192>}, {transform_indices = @transform_1, window_bounds = array<i64: 1, 8, 192>}, {transform_indices = @transform_2, window_bounds = array<i64: 1, 8, 192>}, {transform_indices = @transform_3, window_bounds = array<i64: 1, 8, 8>}, {pipeline_mode = #tpu.pipeline_mode<synchronous>, transform_indices = @transform_4, window_bounds = array<i64: 192, 512>}, {pipeline_mode = #tpu.pipeline_mode<synchronous>, transform_indices = @transform_5, window_bounds = array<i64: 192, 512>}, {pipeline_mode = #tpu.pipeline_mode<synchronous>, transform_indices = @transform_6, window_bounds = array<i64: 192, 512>}, {pipeline_mode = #tpu.pipeline_mode<synchronous>, transform_indices = @transform_7, window_bounds = array<i64: 512, 192>}, {pipeline_mode = #tpu.pipeline_mode<synchronous>, transform_indices = @transform_8, window_bounds = array<i64: 1, 192>}, {pipeline_mode = #tpu.pipeline_mode<synchronous>, transform_indices = @transform_9, window_bounds = array<i64: 1, 192>}, {transform_indices = @transform_10, window_bounds = array<i64: 1, 8, 192>}, {transform_indices = @transform_11, window_bounds = array<i64: 1, 8, 64>}]} {
    %c0 = arith.constant 0 : index
    %c0_0 = arith.constant 0 : index
    %c0_1 = arith.constant 0 : index
    %0 = vector.load %arg1[%c0, %c0_0, %c0_1] : memref<1x8x192xf32, #tpu.memory_space<vmem>>, vector<1x8x192xf32>
    %1 = vector.shape_cast %0 : vector<1x8x192xf32> to vector<8x192xf32>
    %2 = arith.truncf %1 : vector<8x192xf32> to vector<8x192xbf16>
    %c0_2 = arith.constant 0 : index
    %c0_3 = arith.constant 0 : index
    %c0_4 = arith.constant 0 : index
    %3 = vector.load %arg2[%c0_2, %c0_3, %c0_4] : memref<1x8x192xf32, #tpu.memory_space<vmem>>, vector<1x8x192xf32>
    %4 = vector.shape_cast %3 : vector<1x8x192xf32> to vector<8x192xf32>
    %5 = arith.truncf %4 : vector<8x192xf32> to vector<8x192xbf16>
    %c0_5 = arith.constant 0 : index
    %c0_6 = arith.constant 0 : index
    %c0_7 = arith.constant 0 : index
    %6 = vector.load %arg3[%c0_5, %c0_6, %c0_7] : memref<1x8x192xf32, #tpu.memory_space<vmem>>, vector<1x8x192xf32>
    %7 = vector.shape_cast %6 : vector<1x8x192xf32> to vector<8x192xf32>
    %8 = arith.truncf %7 : vector<8x192xf32> to vector<8x192xbf16>
    %c0_8 = arith.constant 0 : index
    %c0_9 = arith.constant 0 : index
    %c0_10 = arith.constant 0 : index
    %9 = vector.load %arg4[%c0_8, %c0_9, %c0_10] : memref<1x8x8xf32, #tpu.memory_space<vmem>>, vector<1x8x8xf32>
    %c0_11 = arith.constant 0 : index
    %c0_12 = arith.constant 0 : index
    %10 = vector.load %arg5[%c0_11, %c0_12] : memref<192x512xbf16, #tpu.memory_space<vmem>>, vector<192x512xbf16>
    %cst = arith.constant dense<0.000000e+00> : vector<8x512xf32>
    %11 = tpu.matmul %2, %10, %cst {dimension_numbers = #tpu.dot_dimension_numbers<[1], [0], [0], [1], [0, 0, 1, 1], [], []>} : vector<8x192xbf16>, vector<192x512xbf16>, vector<8x512xf32> -> vector<8x512xf32>
    %c0_13 = arith.constant 0 : index
    %c0_14 = arith.constant 0 : index
    %12 = vector.load %arg6[%c0_13, %c0_14] : memref<192x512xbf16, #tpu.memory_space<vmem>>, vector<192x512xbf16>
    %cst_15 = arith.constant dense<0.000000e+00> : vector<8x512xf32>
    %13 = tpu.matmul %5, %12, %cst_15 {dimension_numbers = #tpu.dot_dimension_numbers<[1], [0], [0], [1], [0, 0, 1, 1], [], []>} : vector<8x192xbf16>, vector<192x512xbf16>, vector<8x512xf32> -> vector<8x512xf32>
    %c0_16 = arith.constant 0 : index
    %c0_17 = arith.constant 0 : index
    %14 = vector.load %arg7[%c0_16, %c0_17] : memref<192x512xbf16, #tpu.memory_space<vmem>>, vector<192x512xbf16>
    %cst_18 = arith.constant dense<0.000000e+00> : vector<8x512xf32>
    %15 = tpu.matmul %8, %14, %cst_18 {dimension_numbers = #tpu.dot_dimension_numbers<[1], [0], [0], [1], [0, 0, 1, 1], [], []>} : vector<8x192xbf16>, vector<192x512xbf16>, vector<8x512xf32> -> vector<8x512xf32>
    %16 = arith.truncf %11 : vector<8x512xf32> to vector<8x512xbf16>
    %17 = arith.truncf %13 : vector<8x512xf32> to vector<8x512xbf16>
    %18 = arith.truncf %15 : vector<8x512xf32> to vector<8x512xbf16>
    %19 = vector.extract_strided_slice %16 {offsets = [0, 0], sizes = [8, 64], strides = [1, 1]} : vector<8x512xbf16> to vector<8x64xbf16>
    %20 = vector.shape_cast %19 : vector<8x64xbf16> to vector<1x8x64xbf16>
    %21 = vector.extract_strided_slice %17 {offsets = [0, 0], sizes = [8, 64], strides = [1, 1]} : vector<8x512xbf16> to vector<8x64xbf16>
    %22 = vector.shape_cast %21 : vector<8x64xbf16> to vector<1x8x64xbf16>
    %23 = vector.extract_strided_slice %18 {offsets = [0, 0], sizes = [8, 64], strides = [1, 1]} : vector<8x512xbf16> to vector<8x64xbf16>
    %24 = vector.shape_cast %23 : vector<8x64xbf16> to vector<1x8x64xbf16>
    "tpu.trace_start"() <{level = 10 : i32, message = "bqd,bkd->bqk"}> : () -> ()
    %cst_19 = arith.constant dense<0.000000e+00> : vector<1x8x8xf32>
    %25 = tpu.matmul %20, %22, %cst_19 {dimension_numbers = #tpu.dot_dimension_numbers<[2], [2], [1], [1], [0, 0, 0, 1, 1, 1], [0], [0]>} : vector<1x8x64xbf16>, vector<1x8x64xbf16>, vector<1x8x8xf32> -> vector<1x8x8xf32>
    "tpu.trace_stop"() : () -> ()
    %26 = arith.addf %25, %9 : vector<1x8x8xf32>
    %cst_20 = arith.constant dense<0xFF800000> : vector<1x8xf32>
    %27 = vector.multi_reduction <maximumf>, %26, %cst_20 [2] : vector<1x8x8xf32> to vector<1x8xf32>
    %28 = vector.shape_cast %27 : vector<1x8xf32> to vector<1x8x1xf32>
    %29 = vector.broadcast %28 : vector<1x8x1xf32> to vector<1x8x8xf32>
    %30 = arith.subf %26, %29 : vector<1x8x8xf32>
    %31 = math.exp %30 : vector<1x8x8xf32>
    %cst_21 = arith.constant dense<0.000000e+00> : vector<1x8xf32>
    %32 = vector.multi_reduction <add>, %31, %cst_21 [2] : vector<1x8x8xf32> to vector<1x8xf32>
    %33 = vector.shape_cast %32 : vector<1x8xf32> to vector<1x8x1xf32>
    %34 = tpu.reciprocal %33 {approx = true} : vector<1x8x1xf32> -> vector<1x8x1xf32>
    %35 = vector.broadcast %34 : vector<1x8x1xf32> to vector<1x8x8xf32>
    %36 = arith.mulf %31, %35 : vector<1x8x8xf32>
    %37 = arith.truncf %36 : vector<1x8x8xf32> to vector<1x8x8xbf16>
    %c0_22 = arith.constant 0 : index
    %c0_23 = arith.constant 0 : index
    %c0_24 = arith.constant 0 : index
    %38 = vector.load %arg12[%c0_22, %c0_23, %c0_24] : memref<1x8x64xbf16, #tpu.memory_space<vmem>>, vector<1x8x8xbf16>
    tpu.vector_store %arg12[%c0_22, %c0_23, %c0_24], %37 {strides = array<i32>} : memref<1x8x64xbf16, #tpu.memory_space<vmem>>, vector<1x8x8xbf16>,
    %39 = arith.truncf %36 : vector<1x8x8xf32> to vector<1x8x8xbf16>
    "tpu.trace_start"() <{level = 10 : i32, message = "bqk,bkd->bqd"}> : () -> ()
    %cst_25 = arith.constant dense<0.000000e+00> : vector<1x8x64xf32>
    %40 = tpu.matmul %39, %24, %cst_25 {dimension_numbers = #tpu.dot_dimension_numbers<[2], [1], [1], [2], [0, 0, 0, 1, 1, 2], [0], [0]>} : vector<1x8x8xbf16>, vector<1x8x64xbf16>, vector<1x8x64xf32> -> vector<1x8x64xf32>
    "tpu.trace_stop"() : () -> ()
    %41 = vector.shape_cast %40 : vector<1x8x64xf32> to vector<8x64xf32>
    %42 = arith.truncf %41 : vector<8x64xf32> to vector<8x64xbf16>
    %c0_26 = arith.constant 0 : index
    %c0_27 = arith.constant 0 : index
    %43 = vector.load %arg13[%c0_26, %c0_27] : memref<8x512xbf16, #tpu.memory_space<vmem>>, vector<8x64xbf16>
    tpu.vector_store %arg13[%c0_26, %c0_27], %42 {strides = array<i32>} : memref<8x512xbf16, #tpu.memory_space<vmem>>, vector<8x64xbf16>,
    %44 = vector.extract_strided_slice %16 {offsets = [0, 64], sizes = [8, 64], strides = [1, 1]} : vector<8x512xbf16> to vector<8x64xbf16>
    %45 = vector.shape_cast %44 : vector<8x64xbf16> to vector<1x8x64xbf16>
    %46 = vector.extract_strided_slice %17 {offsets = [0, 64], sizes = [8, 64], strides = [1, 1]} : vector<8x512xbf16> to vector<8x64xbf16>
    %47 = vector.shape_cast %46 : vector<8x64xbf16> to vector<1x8x64xbf16>
    %48 = vector.extract_strided_slice %18 {offsets = [0, 64], sizes = [8, 64], strides = [1, 1]} : vector<8x512xbf16> to vector<8x64xbf16>
    %49 = vector.shape_cast %48 : vector<8x64xbf16> to vector<1x8x64xbf16>
    "tpu.trace_start"() <{level = 10 : i32, message = "bqd,bkd->bqk"}> : () -> ()
    %cst_28 = arith.constant dense<0.000000e+00> : vector<1x8x8xf32>
    %50 = tpu.matmul %45, %47, %cst_28 {dimension_numbers = #tpu.dot_dimension_numbers<[2], [2], [1], [1], [0, 0, 0, 1, 1, 1], [0], [0]>} : vector<1x8x64xbf16>, vector<1x8x64xbf16>, vector<1x8x8xf32> -> vector<1x8x8xf32>
    "tpu.trace_stop"() : () -> ()
    %51 = arith.addf %50, %9 : vector<1x8x8xf32>
    %cst_29 = arith.constant dense<0xFF800000> : vector<1x8xf32>
    %52 = vector.multi_reduction <maximumf>, %51, %cst_29 [2] : vector<1x8x8xf32> to vector<1x8xf32>
    %53 = vector.shape_cast %52 : vector<1x8xf32> to vector<1x8x1xf32>
    %54 = vector.broadcast %53 : vector<1x8x1xf32> to vector<1x8x8xf32>
    %55 = arith.subf %51, %54 : vector<1x8x8xf32>
    %56 = math.exp %55 : vector<1x8x8xf32>
    %cst_30 = arith.constant dense<0.000000e+00> : vector<1x8xf32>
    %57 = vector.multi_reduction <add>, %56, %cst_30 [2] : vector<1x8x8xf32> to vector<1x8xf32>
    %58 = vector.shape_cast %57 : vector<1x8xf32> to vector<1x8x1xf32>
    %59 = tpu.reciprocal %58 {approx = true} : vector<1x8x1xf32> -> vector<1x8x1xf32>
    %60 = vector.broadcast %59 : vector<1x8x1xf32> to vector<1x8x8xf32>
    %61 = arith.mulf %56, %60 : vector<1x8x8xf32>
    %62 = arith.truncf %61 : vector<1x8x8xf32> to vector<1x8x8xbf16>
    %c0_31 = arith.constant 0 : index
    %c0_32 = arith.constant 0 : index
    %c8 = arith.constant 8 : index
    %63 = vector.load %arg12[%c0_31, %c0_32, %c8] : memref<1x8x64xbf16, #tpu.memory_space<vmem>>, vector<1x8x8xbf16>
    tpu.vector_store %arg12[%c0_31, %c0_32, %c8], %62 {strides = array<i32>} : memref<1x8x64xbf16, #tpu.memory_space<vmem>>, vector<1x8x8xbf16>,
    %64 = arith.truncf %61 : vector<1x8x8xf32> to vector<1x8x8xbf16>
    "tpu.trace_start"() <{level = 10 : i32, message = "bqk,bkd->bqd"}> : () -> ()
    %cst_33 = arith.constant dense<0.000000e+00> : vector<1x8x64xf32>
    %65 = tpu.matmul %64, %49, %cst_33 {dimension_numbers = #tpu.dot_dimension_numbers<[2], [1], [1], [2], [0, 0, 0, 1, 1, 2], [0], [0]>} : vector<1x8x8xbf16>, vector<1x8x64xbf16>, vector<1x8x64xf32> -> vector<1x8x64xf32>
    "tpu.trace_stop"() : () -> ()
    %66 = vector.shape_cast %65 : vector<1x8x64xf32> to vector<8x64xf32>
    %67 = arith.truncf %66 : vector<8x64xf32> to vector<8x64xbf16>
    %c0_34 = arith.constant 0 : index
    %c64 = arith.constant 64 : index
    %68 = vector.load %arg13[%c0_34, %c64] : memref<8x512xbf16, #tpu.memory_space<vmem>>, vector<8x64xbf16>
    tpu.vector_store %arg13[%c0_34, %c64], %67 {strides = array<i32>} : memref<8x512xbf16, #tpu.memory_space<vmem>>, vector<8x64xbf16>,
    %69 = vector.extract_strided_slice %16 {offsets = [0, 128], sizes = [8, 64], strides = [1, 1]} : vector<8x512xbf16> to vector<8x64xbf16>
    %70 = vector.shape_cast %69 : vector<8x64xbf16> to vector<1x8x64xbf16>
    %71 = vector.extract_strided_slice %17 {offsets = [0, 128], sizes = [8, 64], strides = [1, 1]} : vector<8x512xbf16> to vector<8x64xbf16>
    %72 = vector.shape_cast %71 : vector<8x64xbf16> to vector<1x8x64xbf16>
    %73 = vector.extract_strided_slice %18 {offsets = [0, 128], sizes = [8, 64], strides = [1, 1]} : vector<8x512xbf16> to vector<8x64xbf16>
    %74 = vector.shape_cast %73 : vector<8x64xbf16> to vector<1x8x64xbf16>
    "tpu.trace_start"() <{level = 10 : i32, message = "bqd,bkd->bqk"}> : () -> ()
    %cst_35 = arith.constant dense<0.000000e+00> : vector<1x8x8xf32>
    %75 = tpu.matmul %70, %72, %cst_35 {dimension_numbers = #tpu.dot_dimension_numbers<[2], [2], [1], [1], [0, 0, 0, 1, 1, 1], [0], [0]>} : vector<1x8x64xbf16>, vector<1x8x64xbf16>, vector<1x8x8xf32> -> vector<1x8x8xf32>
    "tpu.trace_stop"() : () -> ()
    %76 = arith.addf %75, %9 : vector<1x8x8xf32>
    %cst_36 = arith.constant dense<0xFF800000> : vector<1x8xf32>
    %77 = vector.multi_reduction <maximumf>, %76, %cst_36 [2] : vector<1x8x8xf32> to vector<1x8xf32>
    %78 = vector.shape_cast %77 : vector<1x8xf32> to vector<1x8x1xf32>
    %79 = vector.broadcast %78 : vector<1x8x1xf32> to vector<1x8x8xf32>
    %80 = arith.subf %76, %79 : vector<1x8x8xf32>
    %81 = math.exp %80 : vector<1x8x8xf32>
    %cst_37 = arith.constant dense<0.000000e+00> : vector<1x8xf32>
    %82 = vector.multi_reduction <add>, %81, %cst_37 [2] : vector<1x8x8xf32> to vector<1x8xf32>
    %83 = vector.shape_cast %82 : vector<1x8xf32> to vector<1x8x1xf32>
    %84 = tpu.reciprocal %83 {approx = true} : vector<1x8x1xf32> -> vector<1x8x1xf32>
    %85 = vector.broadcast %84 : vector<1x8x1xf32> to vector<1x8x8xf32>
    %86 = arith.mulf %81, %85 : vector<1x8x8xf32>
    %87 = arith.truncf %86 : vector<1x8x8xf32> to vector<1x8x8xbf16>
    %c0_38 = arith.constant 0 : index
    %c0_39 = arith.constant 0 : index
    %c16 = arith.constant 16 : index
    %88 = vector.load %arg12[%c0_38, %c0_39, %c16] : memref<1x8x64xbf16, #tpu.memory_space<vmem>>, vector<1x8x8xbf16>
    tpu.vector_store %arg12[%c0_38, %c0_39, %c16], %87 {strides = array<i32>} : memref<1x8x64xbf16, #tpu.memory_space<vmem>>, vector<1x8x8xbf16>,
    %89 = arith.truncf %86 : vector<1x8x8xf32> to vector<1x8x8xbf16>
    "tpu.trace_start"() <{level = 10 : i32, message = "bqk,bkd->bqd"}> : () -> ()
    %cst_40 = arith.constant dense<0.000000e+00> : vector<1x8x64xf32>
    %90 = tpu.matmul %89, %74, %cst_40 {dimension_numbers = #tpu.dot_dimension_numbers<[2], [1], [1], [2], [0, 0, 0, 1, 1, 2], [0], [0]>} : vector<1x8x8xbf16>, vector<1x8x64xbf16>, vector<1x8x64xf32> -> vector<1x8x64xf32>
    "tpu.trace_stop"() : () -> ()
    %91 = vector.shape_cast %90 : vector<1x8x64xf32> to vector<8x64xf32>
    %92 = arith.truncf %91 : vector<8x64xf32> to vector<8x64xbf16>
    %c0_41 = arith.constant 0 : index
    %c128 = arith.constant 128 : index
    %93 = vector.load %arg13[%c0_41, %c128] : memref<8x512xbf16, #tpu.memory_space<vmem>>, vector<8x64xbf16>
    tpu.vector_store %arg13[%c0_41, %c128], %92 {strides = array<i32>} : memref<8x512xbf16, #tpu.memory_space<vmem>>, vector<8x64xbf16>,
    %94 = vector.extract_strided_slice %16 {offsets = [0, 192], sizes = [8, 64], strides = [1, 1]} : vector<8x512xbf16> to vector<8x64xbf16>
    %95 = vector.shape_cast %94 : vector<8x64xbf16> to vector<1x8x64xbf16>
    %96 = vector.extract_strided_slice %17 {offsets = [0, 192], sizes = [8, 64], strides = [1, 1]} : vector<8x512xbf16> to vector<8x64xbf16>
    %97 = vector.shape_cast %96 : vector<8x64xbf16> to vector<1x8x64xbf16>
    %98 = vector.extract_strided_slice %18 {offsets = [0, 192], sizes = [8, 64], strides = [1, 1]} : vector<8x512xbf16> to vector<8x64xbf16>
    %99 = vector.shape_cast %98 : vector<8x64xbf16> to vector<1x8x64xbf16>
    "tpu.trace_start"() <{level = 10 : i32, message = "bqd,bkd->bqk"}> : () -> ()
    %cst_42 = arith.constant dense<0.000000e+00> : vector<1x8x8xf32>
    %100 = tpu.matmul %95, %97, %cst_42 {dimension_numbers = #tpu.dot_dimension_numbers<[2], [2], [1], [1], [0, 0, 0, 1, 1, 1], [0], [0]>} : vector<1x8x64xbf16>, vector<1x8x64xbf16>, vector<1x8x8xf32> -> vector<1x8x8xf32>
    "tpu.trace_stop"() : () -> ()
    %101 = arith.addf %100, %9 : vector<1x8x8xf32>
    %cst_43 = arith.constant dense<0xFF800000> : vector<1x8xf32>
    %102 = vector.multi_reduction <maximumf>, %101, %cst_43 [2] : vector<1x8x8xf32> to vector<1x8xf32>
    %103 = vector.shape_cast %102 : vector<1x8xf32> to vector<1x8x1xf32>
    %104 = vector.broadcast %103 : vector<1x8x1xf32> to vector<1x8x8xf32>
    %105 = arith.subf %101, %104 : vector<1x8x8xf32>
    %106 = math.exp %105 : vector<1x8x8xf32>
    %cst_44 = arith.constant dense<0.000000e+00> : vector<1x8xf32>
    %107 = vector.multi_reduction <add>, %106, %cst_44 [2] : vector<1x8x8xf32> to vector<1x8xf32>
    %108 = vector.shape_cast %107 : vector<1x8xf32> to vector<1x8x1xf32>
    %109 = tpu.reciprocal %108 {approx = true} : vector<1x8x1xf32> -> vector<1x8x1xf32>
    %110 = vector.broadcast %109 : vector<1x8x1xf32> to vector<1x8x8xf32>
    %111 = arith.mulf %106, %110 : vector<1x8x8xf32>
    %112 = arith.truncf %111 : vector<1x8x8xf32> to vector<1x8x8xbf16>
    %c0_45 = arith.constant 0 : index
    %c0_46 = arith.constant 0 : index
    %c24 = arith.constant 24 : index
    %113 = vector.load %arg12[%c0_45, %c0_46, %c24] : memref<1x8x64xbf16, #tpu.memory_space<vmem>>, vector<1x8x8xbf16>
    tpu.vector_store %arg12[%c0_45, %c0_46, %c24], %112 {strides = array<i32>} : memref<1x8x64xbf16, #tpu.memory_space<vmem>>, vector<1x8x8xbf16>,
    %114 = arith.truncf %111 : vector<1x8x8xf32> to vector<1x8x8xbf16>
    "tpu.trace_start"() <{level = 10 : i32, message = "bqk,bkd->bqd"}> : () -> ()
    %cst_47 = arith.constant dense<0.000000e+00> : vector<1x8x64xf32>
    %115 = tpu.matmul %114, %99, %cst_47 {dimension_numbers = #tpu.dot_dimension_numbers<[2], [1], [1], [2], [0, 0, 0, 1, 1, 2], [0], [0]>} : vector<1x8x8xbf16>, vector<1x8x64xbf16>, vector<1x8x64xf32> -> vector<1x8x64xf32>
    "tpu.trace_stop"() : () -> ()
    %116 = vector.shape_cast %115 : vector<1x8x64xf32> to vector<8x64xf32>
    %117 = arith.truncf %116 : vector<8x64xf32> to vector<8x64xbf16>
    %c0_48 = arith.constant 0 : index
    %c192 = arith.constant 192 : index
    %118 = vector.load %arg13[%c0_48, %c192] : memref<8x512xbf16, #tpu.memory_space<vmem>>, vector<8x64xbf16>
    tpu.vector_store %arg13[%c0_48, %c192], %117 {strides = array<i32>} : memref<8x512xbf16, #tpu.memory_space<vmem>>, vector<8x64xbf16>,
    %119 = vector.extract_strided_slice %16 {offsets = [0, 256], sizes = [8, 64], strides = [1, 1]} : vector<8x512xbf16> to vector<8x64xbf16>
    %120 = vector.shape_cast %119 : vector<8x64xbf16> to vector<1x8x64xbf16>
    %121 = vector.extract_strided_slice %17 {offsets = [0, 256], sizes = [8, 64], strides = [1, 1]} : vector<8x512xbf16> to vector<8x64xbf16>
    %122 = vector.shape_cast %121 : vector<8x64xbf16> to vector<1x8x64xbf16>
    %123 = vector.extract_strided_slice %18 {offsets = [0, 256], sizes = [8, 64], strides = [1, 1]} : vector<8x512xbf16> to vector<8x64xbf16>
    %124 = vector.shape_cast %123 : vector<8x64xbf16> to vector<1x8x64xbf16>
    "tpu.trace_start"() <{level = 10 : i32, message = "bqd,bkd->bqk"}> : () -> ()
    %cst_49 = arith.constant dense<0.000000e+00> : vector<1x8x8xf32>
    %125 = tpu.matmul %120, %122, %cst_49 {dimension_numbers = #tpu.dot_dimension_numbers<[2], [2], [1], [1], [0, 0, 0, 1, 1, 1], [0], [0]>} : vector<1x8x64xbf16>, vector<1x8x64xbf16>, vector<1x8x8xf32> -> vector<1x8x8xf32>
    "tpu.trace_stop"() : () -> ()
    %126 = arith.addf %125, %9 : vector<1x8x8xf32>
    %cst_50 = arith.constant dense<0xFF800000> : vector<1x8xf32>
    %127 = vector.multi_reduction <maximumf>, %126, %cst_50 [2] : vector<1x8x8xf32> to vector<1x8xf32>
    %128 = vector.shape_cast %127 : vector<1x8xf32> to vector<1x8x1xf32>
    %129 = vector.broadcast %128 : vector<1x8x1xf32> to vector<1x8x8xf32>
    %130 = arith.subf %126, %129 : vector<1x8x8xf32>
    %131 = math.exp %130 : vector<1x8x8xf32>
    %cst_51 = arith.constant dense<0.000000e+00> : vector<1x8xf32>
    %132 = vector.multi_reduction <add>, %131, %cst_51 [2] : vector<1x8x8xf32> to vector<1x8xf32>
    %133 = vector.shape_cast %132 : vector<1x8xf32> to vector<1x8x1xf32>
    %134 = tpu.reciprocal %133 {approx = true} : vector<1x8x1xf32> -> vector<1x8x1xf32>
    %135 = vector.broadcast %134 : vector<1x8x1xf32> to vector<1x8x8xf32>
    %136 = arith.mulf %131, %135 : vector<1x8x8xf32>
    %137 = arith.truncf %136 : vector<1x8x8xf32> to vector<1x8x8xbf16>
    %c0_52 = arith.constant 0 : index
    %c0_53 = arith.constant 0 : index
    %c32 = arith.constant 32 : index
    %138 = vector.load %arg12[%c0_52, %c0_53, %c32] : memref<1x8x64xbf16, #tpu.memory_space<vmem>>, vector<1x8x8xbf16>
    tpu.vector_store %arg12[%c0_52, %c0_53, %c32], %137 {strides = array<i32>} : memref<1x8x64xbf16, #tpu.memory_space<vmem>>, vector<1x8x8xbf16>,
    %139 = arith.truncf %136 : vector<1x8x8xf32> to vector<1x8x8xbf16>
    "tpu.trace_start"() <{level = 10 : i32, message = "bqk,bkd->bqd"}> : () -> ()
    %cst_54 = arith.constant dense<0.000000e+00> : vector<1x8x64xf32>
    %140 = tpu.matmul %139, %124, %cst_54 {dimension_numbers = #tpu.dot_dimension_numbers<[2], [1], [1], [2], [0, 0, 0, 1, 1, 2], [0], [0]>} : vector<1x8x8xbf16>, vector<1x8x64xbf16>, vector<1x8x64xf32> -> vector<1x8x64xf32>
    "tpu.trace_stop"() : () -> ()
    %141 = vector.shape_cast %140 : vector<1x8x64xf32> to vector<8x64xf32>
    %142 = arith.truncf %141 : vector<8x64xf32> to vector<8x64xbf16>
    %c0_55 = arith.constant 0 : index
    %c256 = arith.constant 256 : index
    %143 = vector.load %arg13[%c0_55, %c256] : memref<8x512xbf16, #tpu.memory_space<vmem>>, vector<8x64xbf16>
    tpu.vector_store %arg13[%c0_55, %c256], %142 {strides = array<i32>} : memref<8x512xbf16, #tpu.memory_space<vmem>>, vector<8x64xbf16>,
    %144 = vector.extract_strided_slice %16 {offsets = [0, 320], sizes = [8, 64], strides = [1, 1]} : vector<8x512xbf16> to vector<8x64xbf16>
    %145 = vector.shape_cast %144 : vector<8x64xbf16> to vector<1x8x64xbf16>
    %146 = vector.extract_strided_slice %17 {offsets = [0, 320], sizes = [8, 64], strides = [1, 1]} : vector<8x512xbf16> to vector<8x64xbf16>
    %147 = vector.shape_cast %146 : vector<8x64xbf16> to vector<1x8x64xbf16>
    %148 = vector.extract_strided_slice %18 {offsets = [0, 320], sizes = [8, 64], strides = [1, 1]} : vector<8x512xbf16> to vector<8x64xbf16>
    %149 = vector.shape_cast %148 : vector<8x64xbf16> to vector<1x8x64xbf16>
    "tpu.trace_start"() <{level = 10 : i32, message = "bqd,bkd->bqk"}> : () -> ()
    %cst_56 = arith.constant dense<0.000000e+00> : vector<1x8x8xf32>
    %150 = tpu.matmul %145, %147, %cst_56 {dimension_numbers = #tpu.dot_dimension_numbers<[2], [2], [1], [1], [0, 0, 0, 1, 1, 1], [0], [0]>} : vector<1x8x64xbf16>, vector<1x8x64xbf16>, vector<1x8x8xf32> -> vector<1x8x8xf32>
    "tpu.trace_stop"() : () -> ()
    %151 = arith.addf %150, %9 : vector<1x8x8xf32>
    %cst_57 = arith.constant dense<0xFF800000> : vector<1x8xf32>
    %152 = vector.multi_reduction <maximumf>, %151, %cst_57 [2] : vector<1x8x8xf32> to vector<1x8xf32>
    %153 = vector.shape_cast %152 : vector<1x8xf32> to vector<1x8x1xf32>
    %154 = vector.broadcast %153 : vector<1x8x1xf32> to vector<1x8x8xf32>
    %155 = arith.subf %151, %154 : vector<1x8x8xf32>
    %156 = math.exp %155 : vector<1x8x8xf32>
    %cst_58 = arith.constant dense<0.000000e+00> : vector<1x8xf32>
    %157 = vector.multi_reduction <add>, %156, %cst_58 [2] : vector<1x8x8xf32> to vector<1x8xf32>
    %158 = vector.shape_cast %157 : vector<1x8xf32> to vector<1x8x1xf32>
    %159 = tpu.reciprocal %158 {approx = true} : vector<1x8x1xf32> -> vector<1x8x1xf32>
    %160 = vector.broadcast %159 : vector<1x8x1xf32> to vector<1x8x8xf32>
    %161 = arith.mulf %156, %160 : vector<1x8x8xf32>
    %162 = arith.truncf %161 : vector<1x8x8xf32> to vector<1x8x8xbf16>
    %c0_59 = arith.constant 0 : index
    %c0_60 = arith.constant 0 : index
    %c40 = arith.constant 40 : index
    %163 = vector.load %arg12[%c0_59, %c0_60, %c40] : memref<1x8x64xbf16, #tpu.memory_space<vmem>>, vector<1x8x8xbf16>
    tpu.vector_store %arg12[%c0_59, %c0_60, %c40], %162 {strides = array<i32>} : memref<1x8x64xbf16, #tpu.memory_space<vmem>>, vector<1x8x8xbf16>,
    %164 = arith.truncf %161 : vector<1x8x8xf32> to vector<1x8x8xbf16>
    "tpu.trace_start"() <{level = 10 : i32, message = "bqk,bkd->bqd"}> : () -> ()
    %cst_61 = arith.constant dense<0.000000e+00> : vector<1x8x64xf32>
    %165 = tpu.matmul %164, %149, %cst_61 {dimension_numbers = #tpu.dot_dimension_numbers<[2], [1], [1], [2], [0, 0, 0, 1, 1, 2], [0], [0]>} : vector<1x8x8xbf16>, vector<1x8x64xbf16>, vector<1x8x64xf32> -> vector<1x8x64xf32>
    "tpu.trace_stop"() : () -> ()
    %166 = vector.shape_cast %165 : vector<1x8x64xf32> to vector<8x64xf32>
    %167 = arith.truncf %166 : vector<8x64xf32> to vector<8x64xbf16>
    %c0_62 = arith.constant 0 : index
    %c320 = arith.constant 320 : index
    %168 = vector.load %arg13[%c0_62, %c320] : memref<8x512xbf16, #tpu.memory_space<vmem>>, vector<8x64xbf16>
    tpu.vector_store %arg13[%c0_62, %c320], %167 {strides = array<i32>} : memref<8x512xbf16, #tpu.memory_space<vmem>>, vector<8x64xbf16>,
    %169 = vector.extract_strided_slice %16 {offsets = [0, 384], sizes = [8, 64], strides = [1, 1]} : vector<8x512xbf16> to vector<8x64xbf16>
    %170 = vector.shape_cast %169 : vector<8x64xbf16> to vector<1x8x64xbf16>
    %171 = vector.extract_strided_slice %17 {offsets = [0, 384], sizes = [8, 64], strides = [1, 1]} : vector<8x512xbf16> to vector<8x64xbf16>
    %172 = vector.shape_cast %171 : vector<8x64xbf16> to vector<1x8x64xbf16>
    %173 = vector.extract_strided_slice %18 {offsets = [0, 384], sizes = [8, 64], strides = [1, 1]} : vector<8x512xbf16> to vector<8x64xbf16>
    %174 = vector.shape_cast %173 : vector<8x64xbf16> to vector<1x8x64xbf16>
    "tpu.trace_start"() <{level = 10 : i32, message = "bqd,bkd->bqk"}> : () -> ()
    %cst_63 = arith.constant dense<0.000000e+00> : vector<1x8x8xf32>
    %175 = tpu.matmul %170, %172, %cst_63 {dimension_numbers = #tpu.dot_dimension_numbers<[2], [2], [1], [1], [0, 0, 0, 1, 1, 1], [0], [0]>} : vector<1x8x64xbf16>, vector<1x8x64xbf16>, vector<1x8x8xf32> -> vector<1x8x8xf32>
    "tpu.trace_stop"() : () -> ()
    %176 = arith.addf %175, %9 : vector<1x8x8xf32>
    %cst_64 = arith.constant dense<0xFF800000> : vector<1x8xf32>
    %177 = vector.multi_reduction <maximumf>, %176, %cst_64 [2] : vector<1x8x8xf32> to vector<1x8xf32>
    %178 = vector.shape_cast %177 : vector<1x8xf32> to vector<1x8x1xf32>
    %179 = vector.broadcast %178 : vector<1x8x1xf32> to vector<1x8x8xf32>
    %180 = arith.subf %176, %179 : vector<1x8x8xf32>
    %181 = math.exp %180 : vector<1x8x8xf32>
    %cst_65 = arith.constant dense<0.000000e+00> : vector<1x8xf32>
    %182 = vector.multi_reduction <add>, %181, %cst_65 [2] : vector<1x8x8xf32> to vector<1x8xf32>
    %183 = vector.shape_cast %182 : vector<1x8xf32> to vector<1x8x1xf32>
    %184 = tpu.reciprocal %183 {approx = true} : vector<1x8x1xf32> -> vector<1x8x1xf32>
    %185 = vector.broadcast %184 : vector<1x8x1xf32> to vector<1x8x8xf32>
    %186 = arith.mulf %181, %185 : vector<1x8x8xf32>
    %187 = arith.truncf %186 : vector<1x8x8xf32> to vector<1x8x8xbf16>
    %c0_66 = arith.constant 0 : index
    %c0_67 = arith.constant 0 : index
    %c48 = arith.constant 48 : index
    %188 = vector.load %arg12[%c0_66, %c0_67, %c48] : memref<1x8x64xbf16, #tpu.memory_space<vmem>>, vector<1x8x8xbf16>
    tpu.vector_store %arg12[%c0_66, %c0_67, %c48], %187 {strides = array<i32>} : memref<1x8x64xbf16, #tpu.memory_space<vmem>>, vector<1x8x8xbf16>,
    %189 = arith.truncf %186 : vector<1x8x8xf32> to vector<1x8x8xbf16>
    "tpu.trace_start"() <{level = 10 : i32, message = "bqk,bkd->bqd"}> : () -> ()
    %cst_68 = arith.constant dense<0.000000e+00> : vector<1x8x64xf32>
    %190 = tpu.matmul %189, %174, %cst_68 {dimension_numbers = #tpu.dot_dimension_numbers<[2], [1], [1], [2], [0, 0, 0, 1, 1, 2], [0], [0]>} : vector<1x8x8xbf16>, vector<1x8x64xbf16>, vector<1x8x64xf32> -> vector<1x8x64xf32>
    "tpu.trace_stop"() : () -> ()
    %191 = vector.shape_cast %190 : vector<1x8x64xf32> to vector<8x64xf32>
    %192 = arith.truncf %191 : vector<8x64xf32> to vector<8x64xbf16>
    %c0_69 = arith.constant 0 : index
    %c384 = arith.constant 384 : index
    %193 = vector.load %arg13[%c0_69, %c384] : memref<8x512xbf16, #tpu.memory_space<vmem>>, vector<8x64xbf16>
    tpu.vector_store %arg13[%c0_69, %c384], %192 {strides = array<i32>} : memref<8x512xbf16, #tpu.memory_space<vmem>>, vector<8x64xbf16>,
    %194 = vector.extract_strided_slice %16 {offsets = [0, 448], sizes = [8, 64], strides = [1, 1]} : vector<8x512xbf16> to vector<8x64xbf16>
    %195 = vector.shape_cast %194 : vector<8x64xbf16> to vector<1x8x64xbf16>
    %196 = vector.extract_strided_slice %17 {offsets = [0, 448], sizes = [8, 64], strides = [1, 1]} : vector<8x512xbf16> to vector<8x64xbf16>
    %197 = vector.shape_cast %196 : vector<8x64xbf16> to vector<1x8x64xbf16>
    %198 = vector.extract_strided_slice %18 {offsets = [0, 448], sizes = [8, 64], strides = [1, 1]} : vector<8x512xbf16> to vector<8x64xbf16>
    %199 = vector.shape_cast %198 : vector<8x64xbf16> to vector<1x8x64xbf16>
    "tpu.trace_start"() <{level = 10 : i32, message = "bqd,bkd->bqk"}> : () -> ()
    %cst_70 = arith.constant dense<0.000000e+00> : vector<1x8x8xf32>
    %200 = tpu.matmul %195, %197, %cst_70 {dimension_numbers = #tpu.dot_dimension_numbers<[2], [2], [1], [1], [0, 0, 0, 1, 1, 1], [0], [0]>} : vector<1x8x64xbf16>, vector<1x8x64xbf16>, vector<1x8x8xf32> -> vector<1x8x8xf32>
    "tpu.trace_stop"() : () -> ()
    %201 = arith.addf %200, %9 : vector<1x8x8xf32>
    %cst_71 = arith.constant dense<0xFF800000> : vector<1x8xf32>
    %202 = vector.multi_reduction <maximumf>, %201, %cst_71 [2] : vector<1x8x8xf32> to vector<1x8xf32>
    %203 = vector.shape_cast %202 : vector<1x8xf32> to vector<1x8x1xf32>
    %204 = vector.broadcast %203 : vector<1x8x1xf32> to vector<1x8x8xf32>
    %205 = arith.subf %201, %204 : vector<1x8x8xf32>
    %206 = math.exp %205 : vector<1x8x8xf32>
    %cst_72 = arith.constant dense<0.000000e+00> : vector<1x8xf32>
    %207 = vector.multi_reduction <add>, %206, %cst_72 [2] : vector<1x8x8xf32> to vector<1x8xf32>
    %208 = vector.shape_cast %207 : vector<1x8xf32> to vector<1x8x1xf32>
    %209 = tpu.reciprocal %208 {approx = true} : vector<1x8x1xf32> -> vector<1x8x1xf32>
    %210 = vector.broadcast %209 : vector<1x8x1xf32> to vector<1x8x8xf32>
    %211 = arith.mulf %206, %210 : vector<1x8x8xf32>
    %212 = arith.truncf %211 : vector<1x8x8xf32> to vector<1x8x8xbf16>
    %c0_73 = arith.constant 0 : index
    %c0_74 = arith.constant 0 : index
    %c56 = arith.constant 56 : index
    %213 = vector.load %arg12[%c0_73, %c0_74, %c56] : memref<1x8x64xbf16, #tpu.memory_space<vmem>>, vector<1x8x8xbf16>
    tpu.vector_store %arg12[%c0_73, %c0_74, %c56], %212 {strides = array<i32>} : memref<1x8x64xbf16, #tpu.memory_space<vmem>>, vector<1x8x8xbf16>,
    %214 = arith.truncf %211 : vector<1x8x8xf32> to vector<1x8x8xbf16>
    "tpu.trace_start"() <{level = 10 : i32, message = "bqk,bkd->bqd"}> : () -> ()
    %cst_75 = arith.constant dense<0.000000e+00> : vector<1x8x64xf32>
    %215 = tpu.matmul %214, %199, %cst_75 {dimension_numbers = #tpu.dot_dimension_numbers<[2], [1], [1], [2], [0, 0, 0, 1, 1, 2], [0], [0]>} : vector<1x8x8xbf16>, vector<1x8x64xbf16>, vector<1x8x64xf32> -> vector<1x8x64xf32>
    "tpu.trace_stop"() : () -> ()
    %216 = vector.shape_cast %215 : vector<1x8x64xf32> to vector<8x64xf32>
    %217 = arith.truncf %216 : vector<8x64xf32> to vector<8x64xbf16>
    %c0_76 = arith.constant 0 : index
    %c448 = arith.constant 448 : index
    %218 = vector.load %arg13[%c0_76, %c448] : memref<8x512xbf16, #tpu.memory_space<vmem>>, vector<8x64xbf16>
    tpu.vector_store %arg13[%c0_76, %c448], %217 {strides = array<i32>} : memref<8x512xbf16, #tpu.memory_space<vmem>>, vector<8x64xbf16>,
    %c0_77 = arith.constant 0 : index
    %c0_78 = arith.constant 0 : index
    %219 = vector.load %arg13[%c0_77, %c0_78] : memref<8x512xbf16, #tpu.memory_space<vmem>>, vector<8x512xbf16>
    %c0_79 = arith.constant 0 : index
    %c0_80 = arith.constant 0 : index
    %220 = vector.load %arg8[%c0_79, %c0_80] : memref<512x192xbf16, #tpu.memory_space<vmem>>, vector<512x192xbf16>
    %cst_81 = arith.constant dense<0.000000e+00> : vector<8x192xf32>
    %221 = tpu.matmul %219, %220, %cst_81 {dimension_numbers = #tpu.dot_dimension_numbers<[1], [0], [0], [1], [0, 0, 1, 1], [], []>} : vector<8x512xbf16>, vector<512x192xbf16>, vector<8x192xf32> -> vector<8x192xf32>
    %222 = arith.addf %221, %1 : vector<8x192xf32>
    %cst_82 = arith.constant dense<0.000000e+00> : vector<8xf32>
    %223 = vector.multi_reduction <add>, %222, %cst_82 [1] : vector<8x192xf32> to vector<8xf32>
    %224 = vector.shape_cast %223 : vector<8xf32> to vector<8x1xf32>
    %cst_83 = arith.constant 1.920000e+02 : f32
    %225 = vector.broadcast %cst_83 : f32 to vector<8x1xf32>
    %226 = arith.divf %224, %225 : vector<8x1xf32>
    %227 = vector.broadcast %226 : vector<8x1xf32> to vector<8x192xf32>
    %228 = arith.subf %222, %227 : vector<8x192xf32>
    %229 = arith.mulf %228, %228 : vector<8x192xf32>
    %cst_84 = arith.constant dense<0.000000e+00> : vector<8xf32>
    %230 = vector.multi_reduction <add>, %229, %cst_84 [1] : vector<8x192xf32> to vector<8xf32>
    %231 = vector.shape_cast %230 : vector<8xf32> to vector<8x1xf32>
    %cst_85 = arith.constant 1.920000e+02 : f32
    %232 = vector.broadcast %cst_85 : f32 to vector<8x1xf32>
    %233 = arith.divf %231, %232 : vector<8x1xf32>
    %234 = vector.broadcast %226 : vector<8x1xf32> to vector<8x192xf32>
    %235 = arith.subf %222, %234 : vector<8x192xf32>
    %cst_86 = arith.constant 9.99999974E-6 : f32
    %236 = vector.broadcast %cst_86 : f32 to vector<8x1xf32>
    %237 = arith.addf %233, %236 : vector<8x1xf32>
    %238 = math.rsqrt %237 : vector<8x1xf32>
    %239 = vector.broadcast %238 : vector<8x1xf32> to vector<8x192xf32>
    %240 = arith.mulf %235, %239 : vector<8x192xf32>
    %c0_87 = arith.constant 0 : index
    %c0_88 = arith.constant 0 : index
    %241 = vector.load %arg9[%c0_87, %c0_88] : memref<1x192xf32, #tpu.memory_space<vmem>>, vector<1x192xf32>
    %242 = vector.broadcast %241 : vector<1x192xf32> to vector<8x192xf32>
    %243 = arith.mulf %240, %242 : vector<8x192xf32>
    %c0_89 = arith.constant 0 : index
    %c0_90 = arith.constant 0 : index
    %244 = vector.load %arg10[%c0_89, %c0_90] : memref<1x192xf32, #tpu.memory_space<vmem>>, vector<1x192xf32>
    %245 = vector.broadcast %244 : vector<1x192xf32> to vector<8x192xf32>
    %246 = arith.addf %243, %245 : vector<8x192xf32>
    %247 = vector.shape_cast %246 : vector<8x192xf32> to vector<1x8x192xf32>
    %c0_91 = arith.constant 0 : index
    %c0_92 = arith.constant 0 : index
    %c0_93 = arith.constant 0 : index
    %248 = vector.load %arg11[%c0_91, %c0_92, %c0_93] : memref<1x8x192xf32, #tpu.memory_space<vmem>>, vector<1x8x192xf32>
    tpu.vector_store %arg11[%c0_91, %c0_92, %c0_93], %247 {strides = array<i32>} : memref<1x8x192xf32, #tpu.memory_space<vmem>>, vector<1x8x192xf32>,
    return
  }
  func.func @transform_0(%arg0: i32) -> (i32, i32, i32) {
    %c0_i32 = arith.constant 0 : i32
    %c0_i32_0 = arith.constant 0 : i32
    %c0_i32_1 = arith.constant 0 : i32
    return %arg0, %c0_i32, %c0_i32_0 : i32, i32, i32
  }
  func.func @transform_1(%arg0: i32) -> (i32, i32, i32) {
    %c0_i32 = arith.constant 0 : i32
    %c0_i32_0 = arith.constant 0 : i32
    %c0_i32_1 = arith.constant 0 : i32
    return %arg0, %c0_i32, %c0_i32_0 : i32, i32, i32
  }
  func.func @transform_2(%arg0: i32) -> (i32, i32, i32) {
    %c0_i32 = arith.constant 0 : i32
    %c0_i32_0 = arith.constant 0 : i32
    %c0_i32_1 = arith.constant 0 : i32
    return %arg0, %c0_i32, %c0_i32_0 : i32, i32, i32
  }
  func.func @transform_3(%arg0: i32) -> (i32, i32, i32) {
    %c0_i32 = arith.constant 0 : i32
    %c0_i32_0 = arith.constant 0 : i32
    %c0_i32_1 = arith.constant 0 : i32
    return %arg0, %c0_i32, %c0_i32_0 : i32, i32, i32
  }
  func.func @transform_4(%arg0: i32) -> (i32, i32) {
    %c0_i32 = arith.constant 0 : i32
    %c0_i32_0 = arith.constant 0 : i32
    %c0_i32_1 = arith.constant 0 : i32
    return %c0_i32, %c0_i32_0 : i32, i32
  }
  func.func @transform_5(%arg0: i32) -> (i32, i32) {
    %c0_i32 = arith.constant 0 : i32
    %c0_i32_0 = arith.constant 0 : i32
    %c0_i32_1 = arith.constant 0 : i32
    return %c0_i32, %c0_i32_0 : i32, i32
  }
  func.func @transform_6(%arg0: i32) -> (i32, i32) {
    %c0_i32 = arith.constant 0 : i32
    %c0_i32_0 = arith.constant 0 : i32
    %c0_i32_1 = arith.constant 0 : i32
    return %c0_i32, %c0_i32_0 : i32, i32
  }
  func.func @transform_7(%arg0: i32) -> (i32, i32) {
    %c0_i32 = arith.constant 0 : i32
    %c0_i32_0 = arith.constant 0 : i32
    %c0_i32_1 = arith.constant 0 : i32
    return %c0_i32, %c0_i32_0 : i32, i32
  }
  func.func @transform_8(%arg0: i32) -> (i32, i32) {
    %c0_i32 = arith.constant 0 : i32
    %c0_i32_0 = arith.constant 0 : i32
    %c0_i32_1 = arith.constant 0 : i32
    return %c0_i32, %c0_i32_0 : i32, i32
  }
  func.func @transform_9(%arg0: i32) -> (i32, i32) {
    %c0_i32 = arith.constant 0 : i32
    %c0_i32_0 = arith.constant 0 : i32
    %c0_i32_1 = arith.constant 0 : i32
    return %c0_i32, %c0_i32_0 : i32, i32
  }
  func.func @transform_10(%arg0: i32) -> (i32, i32, i32) {
    %c0_i32 = arith.constant 0 : i32
    %c0_i32_0 = arith.constant 0 : i32
    %c0_i32_1 = arith.constant 0 : i32
    return %arg0, %c0_i32, %c0_i32_0 : i32, i32, i32
  }
  func.func @transform_11(%arg0: i32) -> (i32, i32, i32) {
    %c0_i32 = arith.constant 0 : i32
    %c0_i32_0 = arith.constant 0 : i32
    %c0_i32_1 = arith.constant 0 : i32
    return %arg0, %c0_i32, %c0_i32_0 : i32, i32, i32
  }
}

</mosaic_0001>

<bundles_post_ra>
// kernel: tpu_custom_call.1
= control target key start
LH: loop header
LB: loop body
LE: loop exit
PB: predicated region body
PF: predicated region fallthrough
CT: control target
= control target key end

     0   :  { %s5237_s0 = inlined_call_operand.vmem [shape: f32[2,8,192], index: 0, kind: input, shape index: {}]   ;;  %s5238_s1 = inlined_call_operand.vmem [shape: f32[2,8,192], index: 1, kind: input, shape index: {}]   ;;  %s5239_s2 = inlined_call_operand.vmem [shape: f32[2,8,192], index: 2, kind: input, shape index: {}]   ;;  %s5240_s3 = inlined_call_operand.vmem [shape: f32[2,8,8], index: 3, kind: input, shape index: {}]   ;;  %s5241_s4 = inlined_call_operand.vmem [shape: bf16[192,512], index: 4, kind: input, shape index: {}]   ;;  %s5242_s5 = inlined_call_operand.vmem [shape: bf16[192,512], index: 5, kind: input, shape index: {}]   ;;  %s5243_s6 = inlined_call_operand.hbm [shape: bf16[192,512], index: 6, kind: input, shape index: {}]   ;;  %s5244_s7 = inlined_call_operand.vmem [shape: bf16[512,192], index: 7, kind: input, shape index: {}]   ;;  %s5245_s8 = inlined_call_operand.vmem [shape: f32[1,192], index: 8, kind: input, shape index: {}]   ;;  %s5246_s9 = inlined_call_operand.vmem [shape: f32[1,192], index: 9, kind: input, shape index: {}]   ;;  %s5247_s10 = inlined_call_operand.hbm [shape: f32[2,8,192], index: 10, kind: output, shape index: {0}]   ;;  %s5248_s11 = inlined_call_operand.hbm [shape: bf16[2,8,64], index: 11, kind: output, shape index: {1}]  }
   0x1   :  { %5253 = sst [smem:[#allocation14_spill]] %s5237_s0 }
   0x2   :  { %5254 = sst [smem:[#allocation15_spill]] %s5243_s6 }
   0x3   :  { %17 = vsyncpa [#allocation4], 0 }
   0x4   :  { %18 = vsyncpa [#allocation5], 0 }
   0x5   :  { %20 = vsyncpa [#allocation5 + $0x1], 0 }
   0x6   :  { %21 = vsyncpa [#allocation8], 0 }
   0x7   :  { %23 = vsyncpa [#allocation8 + $0x1], 0  ;;  %s4323_s17 = smov 0   ;;  %s4325_s18 = smov 0  }
   0x8   :  { %s4327_s19 = smov 0   ;;  %s4329_s20 = smov 0  }
   0x9 LB: > { %5255 = sst [smem:[#allocation12_spill]] %s4242_s19  ;;  %s4344_s21 = sadd.s32 4294967295, %s4246_s20   ;;  %s4246_s20 = sphi %s4329_s20, %s5272_s20   ;;  %s4242_s19 = sphi %s4327_s19, %s5269_s19   ;;  %s4238_s18 = sphi %s4325_s18, %s5271_s18   ;;  %s4234_s17 = sphi %s4323_s17, %s5270_s17  }
   0xa   : > { %s3287_s22 = sadd.s32 4294967294, %s4246_s20   ;;  %s4348_s23 = sadd.s32 1, %s4246_s20  }
   0xb   : > { %s266_s24 = sadd.s32 1, %s4242_s19  ;;  %s263_s25 = ssub.s32 %s4246_s20, %s4348_s23 }
   0xc   : > { %p276_p0 = scmp.ne.s32.totalorder %s4242_s19, %s4238_s18  ;;  %p264_p1 = scmp.eq.s32.totalorder %s263_s25, 0 }
   0xd   : > { %p277_p2 = scmp.eq.s32.totalorder %s4344_s21, 1  ;;  %p282_p3 = scmp.ne.s32.totalorder %s4238_s18, %s4234_s17 }
   0xe   : > { %p283_p4 = scmp.eq.s32.totalorder %s3287_s22, 1  ;;  %p3288_p7 = scmp.ge.s32.totalorder %s4246_s20, 1 }
   0xf   : > { %s4359_s26 = scalar_select %p264_p1, %s4242_s19, %s266_s24  }
  0x10   : > { %p4361_p5 = por %p277_p2, %p276_p0  ;;  %p4365_p6 = por %p283_p4, %p282_p3 }
  0x11   : > { %5256 = sst [smem:[#allocation13_spill]] %s4359_s26  ;;  %p316_p8 = scmp.lt.s32.totalorder %s4246_s20, 3 }
  0x12   : > { %s5257_s27 = scalar_select %p4361_p5, 1, 0 }
  0x13   : > { %s5258_s28 = scalar_select %p4365_p6, 1, 0 }
  0x14   : > { %p5249_p9 = scmp.eq.s32.totalorder %s4344_s21, 0  ;;  %p4372_p10 = pnand %p3288_p7, %p316_p8 }
  0x15   : > { %s4248_s30 = smov [#allocation3]   ;;  %s5261_s6 = sld [smem:[#allocation15_spill]] }
  0x16   : > { %s5259_s29 = scalar_select %p4372_p10, 1, 0 }
  0x17   : > { %s334_s12 = sshll.u32 %s4248_s30, 4  ;;  %p3709_p11 = pneg %p4372_p10  ;;  %s335_s12 = int_to_ptr.vmem [resolvable:$true] %s334_s12 }
  0x19   : > { %p4380_p12 = pnand %p5249_p9, %p3709_p11 }
  0x1b   : > { %s4120_s16 = scalar_lea.hbm %s5261_s6, 6144  ;;  %p4122_p0 = pneg %p4380_p12 }
  0x1c   : > { %p4121_p13 = scmp.ne.s32.totalorder %s5261_s6, %s4120_s16  ;;  %p4127_p3 = scmp.lt.u32.totalorder %s4120_s16, %s5261_s6 }
  0x1e   : > { %p4123_p1 = pnand %p4122_p0, %p4121_p13 }
  0x20   : > { %p4124_p2 = pneg %p4123_p1 }
  0x22   : > { %p4129_p4 = pnand %p4127_p3, %p4124_p2 }
  0x24   : > { %4132 = shalt.err (!%p4129_p4)
}
  0x25   : > { %s4133_s26 = scalar_lea.vmem %s335_s12, 6144  ;;  %p4141_p9 = scmp.lt.s32.totalorder %s335_s12, %s335_s12 }
  0x26   : > { %p4134_p7 = scmp.ne.s32.totalorder %s335_s12, %s4133_s26  ;;  %p4142_p6 = scmp.lt.s32.totalorder %s4133_s26, %s4133_s26 }
  0x28   : > { %p4136_p8 = pnand %p4134_p7, %p4122_p0  ;;  %p4143_p5 = por %p4142_p6, %p4141_p9 }
  0x2a   : > { %p4137_p11 = pneg %p4136_p8 }
  0x2c   : > { %p4144_p10 = pnand %p4143_p5, %p4137_p11 }
  0x2e   : > { %4147 = shalt.err (!%p4144_p10)
}
  0x2f   : > { %s4249_s14 = smov 256   ;;  %s4250_s15 = smov 16  }
  0x30   : > { %3712 = dma.hbm_to_vmem [thread:$0]  (!%p4380_p12), %s5261_s6, 6144, %s335_s12, [#allocation4], %s4249_s14, %s4249_s14, %s4250_s15  }
  0x31   : > { %p5262_p13 = scmp.ne.s32.totalorder %s5259_s29, 0 }
  0x32   : > { %p5263_p1 = scmp.eq.s32.totalorder (!%p5262_p13), %s4344_s21, 0 }
  0x33   : > { %390 = sbr.rel (%p5262_p13) target bundleno = 1994 (0x7ca), region = 60 }
  0x3a   : > { %4221 = dma.done.wait (%p5263_p1), [#allocation4], 6144   ;;  %p5264_p0 = pmov %p5263_p1 }
  0x3b   : > { %v3768_v0 = vld [vmem:[%s5241_s4 + $0x4] ss:$16 sps:$4 sm:$0xff]   ;;  %v3770_v1 = vld [vmem:[%s5241_s4] ss:$16 sps:$4 sm:$0xff]   ;;  %p449_p5 = scmp.lt.s32.totalorder %s4344_s21, 1  ;;  %s5265_s0 = sld [smem:[#allocation14_spill]] }
  0x3c   : > { %4223 = vsyncadd (%p5264_p0), [#allocation4], 4294961152  ;;  %774 = vmatprep.subr.bf16.mxu0 %v3768_v0  ;;  %v3771_v2 = vld [vmem:[%s5241_s4 + $0x24] ss:$16 sps:$4 sm:$0xff]   ;;  %v3773_v3 = vld [vmem:[%s5241_s4 + $0x20] ss:$16 sps:$4 sm:$0xff]  }
  0x3d   : > { %775 = vmatpush1.bf16.msra.mxu0 %v3770_v1  ;;  %v3774_v4 = vld [vmem:[%s5241_s4 + $0x44] ss:$16 sps:$4 sm:$0xff]   ;;  %v3776_v5 = vld [vmem:[%s5241_s4 + $0x40] ss:$16 sps:$4 sm:$0xff]   ;;  %s4429_s25 = scalar_select %p449_p5, %s4344_s21, 1  ;;  %vm770_vm0 = vcmask 523264  }
  0x3e   : > { %776 = vmatprep.subr.bf16.mxu0 %v3771_v2  ;;  %v3777_v6 = vld [vmem:[%s5241_s4 + $0x64] ss:$16 sps:$4 sm:$0xff]   ;;  %v3779_v7 = vld [vmem:[%s5241_s4 + $0x60] ss:$16 sps:$4 sm:$0xff]   ;;  %v3794_v9 = vld [vmem:[%s5241_s4 + $0xc] ss:$16 sps:$4 sm:$0xff]  }
  0x3f   : > { %v3780_v8 = vld [vmem:[%s5241_s4 + $0x84] ss:$16 sps:$4 sm:$0xff]   ;;  %v3797_v10 = vld [vmem:[%s5241_s4 + $0x8] ss:$16 sps:$4 sm:$0xff]   ;;  %815 = vmatprep.subr.bf16.mxu1 %v3794_v9  ;;  %s4444_s16 = sshll.u32 %s4429_s25, 4  ;;  %vm4252_vm1 = vmmov 0  }
  0x40   : > { %v3782_v11 = vld [vmem:[%s5241_s4 + $0x80] ss:$16 sps:$4 sm:$0xff]   ;;  %816 = vmatpush1.bf16.msra.mxu1 %v3797_v10  ;;  %v3800_v12 = vld [vmem:[%s5241_s4 + $0x2c] ss:$16 sps:$4 sm:$0xff]   ;;  %v3803_v13 = vld [vmem:[%s5241_s4 + $0x28] ss:$16 sps:$4 sm:$0xff]   ;;  %s4571_s24 = scalar_lea.vmem %s5238_s1, %s4444_s16  ;;  %s463_s15 = scalar_lea.vmem %s5239_s2, %s4444_s16 }
  0x41   : > { %777 = vmatpush1.bf16.msra.mxu0 %v3773_v3  ;;  %v3783_v14 = vld [vmem:[%s5241_s4 + $0xa4] ss:$16 sps:$4 sm:$0xff]   ;;  %817 = vmatprep.subr.bf16.mxu1 %v3800_v12  ;;  %v3806_v15 = vld [vmem:[%s5241_s4 + $0x4c] ss:$16 sps:$4 sm:$0xff]   ;;  %v3785_v16 = vld [vmem:[%s5241_s4 + $0xa0] ss:$16 sps:$4 sm:$0xff]   ;;  %s4468_s19 = scalar_lea.vmem %s5265_s0, %s4444_s16 }
  0x42   : > { %778 = vmatprep.subr.bf16.mxu0 %v3774_v4  ;;  %v3809_v17 = vld [vmem:[%s5241_s4 + $0x48] ss:$16 sps:$4 sm:$0xff]   ;;  %v3786_v18 = vld [vmem:[%s5241_s4 + $0xc4] ss:$16 sps:$4 sm:$0xff]   ;;  %v3812_v19 = vld [vmem:[%s5241_s4 + $0x6c] ss:$16 sps:$4 sm:$0xff]  }
  0x43   : > { %v470_v20 = vld [vmem:[%s4468_s19 + $0x8] sm:$0xff]  ;;  %v3788_v21 = vld [vmem:[%s5241_s4 + $0xc0] ss:$16 sps:$4 sm:$0xff]   ;;  %v3789_v24 = vld [vmem:[%s5241_s4 + $0xe4] ss:$16 sps:$4 sm:$0xff]   ;;  %s4253_s16 = smov 64  }
  0x44   : > { %818 = vmatpush1.bf16.msra.mxu1 %v3803_v13  ;;  %v472_v22 = vpack.c.bf16 %v470_v20, %v470_v20  ;;  %v3815_v23 = vld [vmem:[%s5241_s4 + $0x68] ss:$16 sps:$4 sm:$0xff]   ;;  %v3816_v25 = vld [vmem:[%s5241_s4 + $0x8c] ss:$16 sps:$4 sm:$0xff]   ;;  %v3791_v26 = vld [vmem:[%s5241_s4 + $0xe0] ss:$16 sps:$4 sm:$0xff]  }
  0x45   : > { %779 = vmatpush1.bf16.msra.mxu0 %v3776_v5  ;;  %819 = vmatprep.subr.bf16.mxu1 %v3806_v15  ;;  %v3792_v27 = vld [vmem:[%s5241_s4 + $0x104] ss:$16 sps:$4 sm:$0xff]   ;;  %v3821_v28 = vld [vmem:[%s5241_s4 + $0x88] ss:$16 sps:$4 sm:$0xff]   ;;  %v3822_v29 = vld [vmem:[%s5241_s4 + $0xac] ss:$16 sps:$4 sm:$0xff]  }
  0x46   : > { %780 = vmatprep.subr.bf16.mxu0 %v3777_v6  ;;  %3350 = vmatprep.mubr.msk.bf16.mxu0 %vm770_vm0, %v472_v22  ;;  %v3796_v30 = vld [vmem:[%s5241_s4 + $0x100] ss:$16 sps:$4 sm:$0xff]   ;;  %v3827_v31 = vld [vmem:[%s5241_s4 + $0xa8] ss:$16 sps:$4 sm:$0xff]   ;;  %v3798_v32 = vld [vmem:[%s5241_s4 + $0x124] ss:$16 sps:$4 sm:$0xff]  }
  0x47   : > { %3351 = vmatprep.mubr.msk.bf16.mxu1 %vm770_vm0, %v472_v22  ;;  %v3828_v33 = vld [vmem:[%s5241_s4 + $0xcc] ss:$16 sps:$4 sm:$0xff]   ;;  %v3802_v34 = vld [vmem:[%s5241_s4 + $0x120] ss:$16 sps:$4 sm:$0xff]   ;;  %v3804_v35 = vld [vmem:[%s5241_s4 + $0x144] ss:$16 sps:$4 sm:$0xff]  }
  0x48   : > { %820 = vmatpush1.bf16.msra.mxu1 %v3809_v17  ;;  %v3833_v36 = vld [vmem:[%s5241_s4 + $0xc8] ss:$16 sps:$4 sm:$0xff]   ;;  %v3834_v37 = vld [vmem:[%s5241_s4 + $0xec] ss:$16 sps:$4 sm:$0xff]   ;;  %v3808_v38 = vld [vmem:[%s5241_s4 + $0x140] ss:$16 sps:$4 sm:$0xff]  }
  0x49   : > { %781 = vmatpush1.bf16.msra.mxu0 %v3779_v7  ;;  %821 = vmatprep.subr.bf16.mxu1 %v3812_v19  ;;  %v3839_v39 = vld [vmem:[%s5241_s4 + $0xe8] ss:$16 sps:$4 sm:$0xff]   ;;  %v3810_v40 = vld [vmem:[%s5241_s4 + $0x164] ss:$16 sps:$4 sm:$0xff]   ;;  %v3840_v41 = vld [vmem:[%s5241_s4 + $0x10c] ss:$16 sps:$4 sm:$0xff]  }
  0x4a   : > { %782 = vmatprep.subr.bf16.mxu0 %v3780_v8  ;;  %v3814_v42 = vld [vmem:[%s5241_s4 + $0x160] ss:$16 sps:$4 sm:$0xff]   ;;  %v3845_v44 = vld [vmem:[%s5241_s4 + $0x108] ss:$16 sps:$4 sm:$0xff]   ;;  %v3820_v45 = vld [vmem:[%s5242_s5 + $0x4] ss:$16 sps:$4 sm:$0xff]  }
  0x4b   : > { %v469_v43 = vld [vmem:[%s4468_s19] sm:$0xff]  ;;  %v3846_v46 = vld [vmem:[%s5241_s4 + $0x12c] ss:$16 sps:$4 sm:$0xff]   ;;  %v3851_v49 = vld [vmem:[%s5241_s4 + $0x128] ss:$16 sps:$4 sm:$0xff]   ;;  %vm1678_vm2 = vcmask 1043456  }
  0x4c   : > { %822 = vmatpush1.bf16.msra.mxu1 %v3815_v23  ;;  %v471_v47 = vpack.c.bf16 %v469_v43, %v469_v43  ;;  %v3818_v48 = vld [vmem:[%s5242_s5] ss:$16 sps:$4 sm:$0xff]   ;;  %v3826_v50 = vld [vmem:[%s5242_s5 + $0x24] ss:$16 sps:$4 sm:$0xff]   ;;  %v3852_v51 = vld [vmem:[%s5241_s4 + $0x14c] ss:$16 sps:$4 sm:$0xff]  }
  0x4d   : > { %783 = vmatpush1.bf16.msra.mxu0 %v3782_v11  ;;  %823 = vmatprep.subr.bf16.mxu1 %v3816_v25  ;;  %v3824_v52 = vld [vmem:[%s5242_s5 + $0x20] ss:$16 sps:$4 sm:$0xff]   ;;  %v3857_v53 = vld [vmem:[%s5241_s4 + $0x148] ss:$16 sps:$4 sm:$0xff]   ;;  %v3832_v54 = vld [vmem:[%s5242_s5 + $0x44] ss:$16 sps:$4 sm:$0xff]  }
  0x4e   : > { %784 = vmatprep.subr.bf16.mxu0 %v3783_v14  ;;  %v3858_v55 = vld [vmem:[%s5241_s4 + $0x16c] ss:$16 sps:$4 sm:$0xff]   ;;  %v3830_v56 = vld [vmem:[%s5242_s5 + $0x40] ss:$16 sps:$4 sm:$0xff]   ;;  %v3838_v57 = vld [vmem:[%s5242_s5 + $0x64] ss:$16 sps:$4 sm:$0xff]  }
  0x4f   : > { %v474_v58 = vld [vmem:[%s4571_s24 + $0x8] sm:$0xff]  ;;  %v3836_v62 = vld [vmem:[%s5242_s5 + $0x60] ss:$16 sps:$4 sm:$0xff]   ;;  %v3844_v63 = vld [vmem:[%s5242_s5 + $0x84] ss:$16 sps:$4 sm:$0xff]   ;;  %vm1660_vm3 = vcmask 64512  }
  0x50   : > { %824 = vmatpush1.bf16.msra.mxu1 %v3821_v28  ;;  %v3863_v59 = vld [vmem:[%s5241_s4 + $0x168] ss:$16 sps:$4 sm:$0xff]   ;;  %v476_v60 = vpack.c.bf16 %v474_v58, %v474_v58  ;;  %v3869_v61 = vld [vmem:[%s5242_s5 + $0xc] ss:$16 sps:$4 sm:$0xff]   ;;  %v3842_v2 = vld [vmem:[%s5242_s5 + $0x80] ss:$16 sps:$4 sm:$0xff]  }
  0x51   : > { %785 = vmatpush1.bf16.msra.mxu0 %v3785_v16  ;;  %825 = vmatprep.subr.bf16.mxu1 %v3822_v29  ;;  %v3867_v0 = vld [vmem:[%s5242_s5 + $0x8] ss:$16 sps:$4 sm:$0xff]   ;;  %v3875_v1 = vld [vmem:[%s5242_s5 + $0x2c] ss:$16 sps:$4 sm:$0xff]   ;;  %v3850_v3 = vld [vmem:[%s5242_s5 + $0xa4] ss:$16 sps:$4 sm:$0xff]  }
  0x52   : > { %786 = vmatprep.subr.bf16.mxu0 %v3786_v18  ;;  %v3873_v4 = vld [vmem:[%s5242_s5 + $0x28] ss:$16 sps:$4 sm:$0xff]   ;;  %v3881_v5 = vld [vmem:[%s5242_s5 + $0x4c] ss:$16 sps:$4 sm:$0xff]   ;;  %v3848_v6 = vld [vmem:[%s5242_s5 + $0xa0] ss:$16 sps:$4 sm:$0xff]  }
  0x53   : > { %v3856_v7 = vld [vmem:[%s5242_s5 + $0xc4] ss:$16 sps:$4 sm:$0xff]   ;;  %v3879_v8 = vld [vmem:[%s5242_s5 + $0x48] ss:$16 sps:$4 sm:$0xff]   ;;  %v3887_v9 = vld [vmem:[%s5242_s5 + $0x6c] ss:$16 sps:$4 sm:$0xff]  }
  0x54   : > { %826 = vmatpush1.bf16.msra.mxu1 %v3827_v31  ;;  %v3854_v10 = vld [vmem:[%s5242_s5 + $0xc0] ss:$16 sps:$4 sm:$0xff]   ;;  %v3885_v11 = vld [vmem:[%s5242_s5 + $0x68] ss:$16 sps:$4 sm:$0xff]   ;;  %v3862_v12 = vld [vmem:[%s5242_s5 + $0xe4] ss:$16 sps:$4 sm:$0xff]  }
  0x55   : > { %787 = vmatpush1.bf16.msra.mxu0 %v3788_v21  ;;  %827 = vmatprep.subr.bf16.mxu1 %v3828_v33  ;;  %v3890_v13 = vld [vmem:[%s5242_s5 + $0x8c] ss:$16 sps:$4 sm:$0xff]   ;;  %v3860_v14 = vld [vmem:[%s5242_s5 + $0xe0] ss:$16 sps:$4 sm:$0xff]   ;;  %v3888_v15 = vld [vmem:[%s5242_s5 + $0x88] ss:$16 sps:$4 sm:$0xff]  }
  0x56   : > { %788 = vmatprep.subr.bf16.mxu0 %v3789_v24  ;;  %v3866_v16 = vld [vmem:[%s5242_s5 + $0x104] ss:$16 sps:$4 sm:$0xff]   ;;  %v3893_v17 = vld [vmem:[%s5242_s5 + $0xac] ss:$16 sps:$4 sm:$0xff]   ;;  %v3864_v18 = vld [vmem:[%s5242_s5 + $0x100] ss:$16 sps:$4 sm:$0xff]  }
  0x57   : > { %v3891_v19 = vld [vmem:[%s5242_s5 + $0xa8] ss:$16 sps:$4 sm:$0xff]   ;;  %v3872_v20 = vld [vmem:[%s5242_s5 + $0x124] ss:$16 sps:$4 sm:$0xff]   ;;  %v3896_v21 = vld [vmem:[%s5242_s5 + $0xcc] ss:$16 sps:$4 sm:$0xff]  }
  0x58   : > { %828 = vmatpush1.bf16.msra.mxu1 %v3833_v36  ;;  %v3870_v22 = vld [vmem:[%s5242_s5 + $0x120] ss:$16 sps:$4 sm:$0xff]   ;;  %v3894_v23 = vld [vmem:[%s5242_s5 + $0xc8] ss:$16 sps:$4 sm:$0xff]   ;;  %v3878_v24 = vld [vmem:[%s5242_s5 + $0x144] ss:$16 sps:$4 sm:$0xff]  }
  0x59   : > { %789 = vmatpush1.bf16.msra.mxu0 %v3791_v26  ;;  %829 = vmatprep.subr.bf16.mxu1 %v3834_v37  ;;  %v3899_v25 = vld [vmem:[%s5242_s5 + $0xec] ss:$16 sps:$4 sm:$0xff]   ;;  %v3876_v26 = vld [vmem:[%s5242_s5 + $0x140] ss:$16 sps:$4 sm:$0xff]   ;;  %v3884_v28 = vld [vmem:[%s5242_s5 + $0x164] ss:$16 sps:$4 sm:$0xff]  }
  0x5a   : > { %790 = vmatprep.subr.bf16.mxu0 %v3792_v27  ;;  %v3897_v27 = vld [vmem:[%s5242_s5 + $0xe8] ss:$16 sps:$4 sm:$0xff]   ;;  %v3902_v29 = vld [vmem:[%s5242_s5 + $0x10c] ss:$16 sps:$4 sm:$0xff]   ;;  %v473_v31 = vld [vmem:[%s4571_s24] sm:$0xff]  ;;  %s3301_s24 = sshll.u32 %s4429_s25, 3 }
  0x5b   : > { %v3905_v33 = vld [vmem:[%s5242_s5 + $0x12c] ss:$16 sps:$4 sm:$0xff]   ;;  %v3912_v36 = vld [vmem:[#allocation3] ss:$16 sps:$4 sm:$0xff]   ;;  %v475_v37 = vpack.c.bf16 %v473_v31, %v473_v31  ;;  %v3941_v58 = vld [vmem:[#allocation3 + $0x124] ss:$16 sps:$4 sm:$0xff]   ;;  %s467_s26 = scalar_lea.vmem %s5240_s3, %s3301_s24 }
  0x5c   : > { %830 = vmatpush1.bf16.msra.mxu1 %v3839_v39  ;;  %v3906_v39 = vld [vmem:[%s5242_s5 + $0x148] ss:$16 sps:$4 sm:$0xff]   ;;  %v3915_v43 = vld [vmem:[#allocation3 + $0x20] ss:$16 sps:$4 sm:$0xff]   ;;  %s4862_s25 = sand.u32 1, %s4238_s18   ;;  %vm1673_vm4 = vcmask 60416  }
  0x5d   : > { %791 = vmatpush1.bf16.msra.mxu0 %v3796_v30  ;;  %831 = vmatprep.subr.bf16.mxu1 %v3840_v41  ;;  %v3882_v30 = vld [vmem:[%s5242_s5 + $0x160] ss:$16 sps:$4 sm:$0xff]   ;;  %v3909_v41 = vld [vmem:[%s5242_s5 + $0x168] ss:$16 sps:$4 sm:$0xff]   ;;  %s3294_s13 = sshll.u32 %s4862_s25, 2  ;;  %s4254_s29 = smov 8  }
  0x5e   : > { %792 = vmatprep.subr.bf16.mxu0 %v3798_v32  ;;  %v3900_v32 = vld [vmem:[%s5242_s5 + $0x108] ss:$16 sps:$4 sm:$0xff]   ;;  %s4870_s12 = scalar_lea.vmem [#allocation7], %s3294_s13  ;;  %s4255_s30 = smov 16   ;;  %vm1723_vm5 = vcmask 519168   ;;  %vm1795_vm6 = vcmask 126016  }
  0x5f   : > { %s4256_s14 = smov 24   ;;  %s4257_s0 = smov 32   ;;  %vm1919_vm7 = vcmask 191616   ;;  %vm2039_vm8 = vcmask 257216   ;;  %vm2162_vm9 = vcmask 322816   ;;  %vm1853_vm10 = vcmask 1043968  }
  0x60   : > { %832 = vmatpush1.bf16.msra.mxu1 %v3845_v44  ;;  %v3918_v44 = vld [vmem:[#allocation3 + $0x40] ss:$16 sps:$4 sm:$0xff]   ;;  %s4259_s24 = smov 56   ;;  %vm2282_vm11 = vcmask 388416   ;;  %vm2405_vm12 = vcmask 454016   ;;  %vm2525_vm13 = vcmask 519616  }
  0x61   : > { %793 = vmatpush1.bf16.msra.mxu0 %v3802_v34  ;;  %833 = vmatprep.subr.bf16.mxu1 %v3846_v46  ;;  %v3914_v34 = vld [vmem:[#allocation3 + $0x4] ss:$16 sps:$4 sm:$0xff]   ;;  %p5266_p9 = scmp.ne.s32.totalorder %s5257_s27, 0 }
  0x62   : > { %794 = vmatprep.subr.bf16.mxu0 %v3804_v35  ;;  %v3903_v35 = vld [vmem:[%s5242_s5 + $0x128] ss:$16 sps:$4 sm:$0xff]   ;;  %v3923_v46 = vld [vmem:[#allocation3 + $0x64] ss:$16 sps:$4 sm:$0xff]  }
  0x64   : > { %834 = vmatpush1.bf16.msra.mxu1 %v3851_v49  ;;  %v3924_v49 = vld [vmem:[#allocation3 + $0x80] ss:$16 sps:$4 sm:$0xff]  }
  0x65   : > { %795 = vmatpush1.bf16.msra.mxu0 %v3808_v38  ;;  %835 = vmatprep.subr.bf16.mxu1 %v3852_v51  ;;  %v3908_v38 = vld [vmem:[%s5242_s5 + $0x14c] ss:$16 sps:$4 sm:$0xff]   ;;  %v3927_v51 = vld [vmem:[#allocation3 + $0xa0] ss:$16 sps:$4 sm:$0xff]  }
  0x66   : > { %796 = vmatprep.subr.bf16.mxu0 %v3810_v40  ;;  %v3911_v40 = vld [vmem:[%s5242_s5 + $0x16c] ss:$16 sps:$4 sm:$0xff]  }
  0x68   : > { %836 = vmatpush1.bf16.msra.mxu1 %v3857_v53  ;;  %v3930_v53 = vld [vmem:[#allocation3 + $0xc0] ss:$16 sps:$4 sm:$0xff]  }
  0x69   : > { %797 = vmatpush1.bf16.msra.mxu0 %v3814_v42  ;;  %837 = vmatprep.subr.bf16.mxu1 %v3858_v55  ;;  %v3917_v42 = vld [vmem:[#allocation3 + $0x24] ss:$16 sps:$4 sm:$0xff]   ;;  %v3933_v55 = vld [vmem:[#allocation3 + $0xe0] ss:$16 sps:$4 sm:$0xff]  }
  0x6a   : > { %1147 = vmatprep.subr.bf16.mxu0 %v3820_v45  ;;  %v3920_v45 = vld [vmem:[#allocation3 + $0x44] ss:$16 sps:$4 sm:$0xff]  }
  0x6c   : > { %807 = vmatmul.mubr.bf16.vlgmr.msra.gmra.mrb[0].mxu0 %v471_v47  ;;  %838 = vmatpush1.bf16.msra.mxu1 %v3863_v59  ;;  %v3939_v59 = vld [vmem:[#allocation3 + $0x120] ss:$16 sps:$4 sm:$0xff]  }
  0x6d   : > { %1148 = vmatpush1.bf16.msra.mxu0 %v3818_v48  ;;  %3400 = vmatprep.mubr.msk.bf16.mxu0 %vm770_vm0, %v476_v60  ;;  %v3926_v48 = vld [vmem:[#allocation3 + $0x84] ss:$16 sps:$4 sm:$0xff]  }
  0x6e   : > { %1149 = vmatprep.subr.bf16.mxu0 %v3826_v50  ;;  %1188 = vmatprep.subr.bf16.mxu1 %v3869_v61  ;;  %v3929_v50 = vld [vmem:[#allocation3 + $0xa4] ss:$16 sps:$4 sm:$0xff]   ;;  %v3942_v61 = vld [vmem:[#allocation3 + $0x140] ss:$16 sps:$4 sm:$0xff]  }
  0x6f   : > { %848 = vmatmul.mubr.bf16.vlgmr.msra.gmra.mrb[0].mxu1 %v471_v47  ;;  %v3921_v47 = vld [vmem:[#allocation3 + $0x60] ss:$16 sps:$4 sm:$0xff]  }
  0x70   : > { %1189 = vmatpush1.bf16.msra.mxu1 %v3867_v0  ;;  %3401 = vmatprep.mubr.msk.bf16.mxu1 %vm770_vm0, %v476_v60  ;;  %v3944_v60 = vld [vmem:[#allocation3 + $0x144] ss:$16 sps:$4 sm:$0xff]   ;;  %v478_v0 = vld [vmem:[%s463_s15 + $0x8] sm:$0xff] }
  0x71   : > { %1150 = vmatpush1.bf16.msra.mxu0 %v3824_v52  ;;  %1190 = vmatprep.subr.bf16.mxu1 %v3875_v1  ;;  %v3932_v52 = vld [vmem:[#allocation3 + $0xc4] ss:$16 sps:$4 sm:$0xff]   ;;  %v480_v1 = vpack.c.bf16 %v478_v0, %v478_v0  ;;  %v3981_v0 = vld [vmem:[#allocation3 + $0x168] ss:$16 sps:$4 sm:$0xff]  }
  0x72   : > { %1151 = vmatprep.subr.bf16.mxu0 %v3832_v54  ;;  %v3935_v54 = vld [vmem:[#allocation3 + $0xe4] ss:$16 sps:$4 sm:$0xff]  }
  0x74   : > { %1191 = vmatpush1.bf16.msra.mxu1 %v3873_v4  ;;  %v4251_v4 = vmov 0.0  }
  0x75   : > { %1152 = vmatpush1.bf16.msra.mxu0 %v3830_v56  ;;  %1192 = vmatprep.subr.bf16.mxu1 %v3881_v5  ;;  %v3938_v56 = vld [vmem:[#allocation3 + $0x104] ss:$16 sps:$4 sm:$0xff]  }
  0x76   : > { %1153 = vmatprep.subr.bf16.mxu0 %v3838_v57  ;;  %v3936_v57 = vld [vmem:[#allocation3 + $0x100] ss:$16 sps:$4 sm:$0xff]  }
  0x78   : > { %1193 = vmatpush1.bf16.msra.mxu1 %v3879_v8 }
  0x79   : > { %1154 = vmatpush1.bf16.msra.mxu0 %v3836_v62  ;;  %1194 = vmatprep.subr.bf16.mxu1 %v3887_v9  ;;  %v3947_v62 = vld [vmem:[#allocation3 + $0x164] ss:$16 sps:$4 sm:$0xff]  }
  0x7a   : > { %1155 = vmatprep.subr.bf16.mxu0 %v3844_v63  ;;  %v3945_v63 = vld [vmem:[#allocation3 + $0x160] ss:$16 sps:$4 sm:$0xff]  }
  0x7c   : > { %1195 = vmatpush1.bf16.msra.mxu1 %v3885_v11 }
  0x7d   : > { %1156 = vmatpush1.bf16.msra.mxu0 %v3842_v2  ;;  %1196 = vmatprep.subr.bf16.mxu1 %v3890_v13  ;;  %v477_v2 = vld [vmem:[%s463_s15] sm:$0xff]  ;;  %s4258_s15 = smov 48  }
  0x7e   : > { %1157 = vmatprep.subr.bf16.mxu0 %v3850_v3  ;;  %v4725_v3 = vpack.c.bf16 %v477_v2, %v477_v2 }
  0x80   : > { %1197 = vmatpush1.bf16.msra.mxu1 %v3888_v15 }
  0x81   : > { %1158 = vmatpush1.bf16.msra.mxu0 %v3848_v6  ;;  %1198 = vmatprep.subr.bf16.mxu1 %v3893_v17 }
  0x82   : > { %1159 = vmatprep.subr.bf16.mxu0 %v3856_v7 }
  0x84   : > { %1199 = vmatpush1.bf16.msra.mxu1 %v3891_v19 }
  0x85   : > { %1160 = vmatpush1.bf16.msra.mxu0 %v3854_v10  ;;  %1200 = vmatprep.subr.bf16.mxu1 %v3896_v21 }
  0x86   : > { %1161 = vmatprep.subr.bf16.mxu0 %v3862_v12 }
  0x88   : > { %1201 = vmatpush1.bf16.msra.mxu1 %v3894_v23 }
  0x89   : > { %1162 = vmatpush1.bf16.msra.mxu0 %v3860_v14  ;;  %1202 = vmatprep.subr.bf16.mxu1 %v3899_v25 }
  0x8a   : > { %1163 = vmatprep.subr.bf16.mxu0 %v3866_v16 }
  0x8c   : > { %1203 = vmatpush1.bf16.msra.mxu1 %v3897_v27 }
  0x8d   : > { %1164 = vmatpush1.bf16.msra.mxu0 %v3864_v18  ;;  %1204 = vmatprep.subr.bf16.mxu1 %v3902_v29 }
  0x8e   : > { %1165 = vmatprep.subr.bf16.mxu0 %v3872_v20 }
  0x90   : > { %1205 = vmatpush1.bf16.msra.mxu1 %v3900_v32 }
  0x91   : > { %1166 = vmatpush1.bf16.msra.mxu0 %v3870_v22  ;;  %1206 = vmatprep.subr.bf16.mxu1 %v3905_v33 }
  0x92   : > { %1167 = vmatprep.subr.bf16.mxu0 %v3878_v24 }
  0x94   : > { %1207 = vmatpush1.bf16.msra.mxu1 %v3903_v35  ;;  %v3950_v35 = vld [vmem:[#allocation3 + $0xc] ss:$16 sps:$4 sm:$0xff]  }
  0x95   : > { %1168 = vmatpush1.bf16.msra.mxu0 %v3876_v26  ;;  %1208 = vmatprep.subr.bf16.mxu1 %v3908_v38  ;;  %v3956_v38 = vld [vmem:[#allocation3 + $0x4c] ss:$16 sps:$4 sm:$0xff]  }
  0x96   : > { %1169 = vmatprep.subr.bf16.mxu0 %v3884_v28 }
  0x98   : > { %1209 = vmatpush1.bf16.msra.mxu1 %v3906_v39  ;;  %v3954_v39 = vld [vmem:[#allocation3 + $0x48] ss:$16 sps:$4 sm:$0xff]  }
  0x99   : > { %1170 = vmatpush1.bf16.msra.mxu0 %v3882_v30  ;;  %1210 = vmatprep.subr.bf16.mxu1 %v3911_v40  ;;  %v3959_v40 = vld [vmem:[#allocation3 + $0x6c] ss:$16 sps:$4 sm:$0xff]  }
  0x9a   : > { %1520 = vmatprep.subr.bf16.mxu0 %v3914_v34  ;;  %v3948_v34 = vld [vmem:[#allocation3 + $0x8] ss:$16 sps:$4 sm:$0xff]  }
  0x9c   : > { %1180 = vmatmul.mubr.bf16.vlgmr.msra.gmra.mrb[4].mxu0 %v475_v37  ;;  %1211 = vmatpush1.bf16.msra.mxu1 %v3909_v41  ;;  %v3957_v41 = vld [vmem:[#allocation3 + $0x68] ss:$16 sps:$4 sm:$0xff]  }
  0x9d   : > { %1521 = vmatpush1.bf16.msra.mxu0 %v3912_v36  ;;  %3450 = vmatprep.mubr.msk.bf16.mxu0 %vm770_vm0, %v480_v1  ;;  %v3953_v36 = vld [vmem:[#allocation3 + $0x2c] ss:$16 sps:$4 sm:$0xff]  }
  0x9e   : > { %1522 = vmatprep.subr.bf16.mxu0 %v3917_v42  ;;  %1561 = vmatprep.subr.bf16.mxu1 %v3950_v35  ;;  %v3962_v42 = vld [vmem:[#allocation3 + $0x8c] ss:$16 sps:$4 sm:$0xff]  }
  0x9f   : > { %1221 = vmatmul.mubr.bf16.vlgmr.msra.gmra.mrb[4].mxu1 %v475_v37  ;;  %v3951_v37 = vld [vmem:[#allocation3 + $0x28] ss:$16 sps:$4 sm:$0xff]  }
  0xa0   : > { %3451 = vmatprep.mubr.msk.bf16.mxu1 %vm770_vm0, %v480_v1  ;;  %1562 = vmatpush1.bf16.msra.mxu1 %v3948_v34 }
  0xa1   : > { %1523 = vmatpush1.bf16.msra.mxu0 %v3915_v43  ;;  %1563 = vmatprep.subr.bf16.mxu1 %v3953_v36  ;;  %v3960_v43 = vld [vmem:[#allocation3 + $0x88] ss:$16 sps:$4 sm:$0xff]  }
  0xa2   : > { %1524 = vmatprep.subr.bf16.mxu0 %v3920_v45 }
  0xa4   : > { %1564 = vmatpush1.bf16.msra.mxu1 %v3951_v37 }
  0xa5   : > { %1525 = vmatpush1.bf16.msra.mxu0 %v3918_v44  ;;  %1565 = vmatprep.subr.bf16.mxu1 %v3956_v38  ;;  %v3965_v44 = vld [vmem:[#allocation3 + $0xac] ss:$16 sps:$4 sm:$0xff]  }
  0xa6   : > { %1526 = vmatprep.subr.bf16.mxu0 %v3923_v46  ;;  %v3963_v46 = vld [vmem:[#allocation3 + $0xa8] ss:$16 sps:$4 sm:$0xff]  }
  0xa8   : > { %1566 = vmatpush1.bf16.msra.mxu1 %v3954_v39 }
  0xa9   : > { %1527 = vmatpush1.bf16.msra.mxu0 %v3921_v47  ;;  %1567 = vmatprep.subr.bf16.mxu1 %v3959_v40 }
  0xaa   : > { %1528 = vmatprep.subr.bf16.mxu0 %v3926_v48  ;;  %v3968_v48 = vld [vmem:[#allocation3 + $0xcc] ss:$16 sps:$4 sm:$0xff]  }
  0xac   : > { %1568 = vmatpush1.bf16.msra.mxu1 %v3957_v41 }
  0xad   : > { %1529 = vmatpush1.bf16.msra.mxu0 %v3924_v49  ;;  %1569 = vmatprep.subr.bf16.mxu1 %v3962_v42  ;;  %v3966_v49 = vld [vmem:[#allocation3 + $0xc8] ss:$16 sps:$4 sm:$0xff]  }
  0xae   : > { %1530 = vmatprep.subr.bf16.mxu0 %v3929_v50  ;;  %v3971_v50 = vld [vmem:[#allocation3 + $0xec] ss:$16 sps:$4 sm:$0xff]  }
  0xb0   : > { %1570 = vmatpush1.bf16.msra.mxu1 %v3960_v43 }
  0xb1   : > { %1531 = vmatpush1.bf16.msra.mxu0 %v3927_v51  ;;  %1571 = vmatprep.subr.bf16.mxu1 %v3965_v44 }
  0xb2   : > { %1532 = vmatprep.subr.bf16.mxu0 %v3932_v52  ;;  %v3969_v52 = vld [vmem:[#allocation3 + $0xe8] ss:$16 sps:$4 sm:$0xff]  }
  0xb4   : > { %1572 = vmatpush1.bf16.msra.mxu1 %v3963_v46 }
  0xb5   : > { %1533 = vmatpush1.bf16.msra.mxu0 %v3930_v53  ;;  %1573 = vmatprep.subr.bf16.mxu1 %v3968_v48 }
  0xb6   : > { %1534 = vmatprep.subr.bf16.mxu0 %v3935_v54  ;;  %v3974_v54 = vld [vmem:[#allocation3 + $0x10c] ss:$16 sps:$4 sm:$0xff]  }
  0xb8   : > { %1574 = vmatpush1.bf16.msra.mxu1 %v3966_v49 }
  0xb9   : > { %1535 = vmatpush1.bf16.msra.mxu0 %v3933_v55  ;;  %1575 = vmatprep.subr.bf16.mxu1 %v3971_v50  ;;  %v3972_v55 = vld [vmem:[#allocation3 + $0x108] ss:$16 sps:$4 sm:$0xff]  }
  0xba   : > { %1536 = vmatprep.subr.bf16.mxu0 %v3938_v56  ;;  %v3977_v56 = vld [vmem:[#allocation3 + $0x12c] ss:$16 sps:$4 sm:$0xff]  }
  0xbc   : > { %1576 = vmatpush1.bf16.msra.mxu1 %v3969_v52 }
  0xbd   : > { %1537 = vmatpush1.bf16.msra.mxu0 %v3936_v57  ;;  %1577 = vmatprep.subr.bf16.mxu1 %v3974_v54 }
  0xbe   : > { %1538 = vmatprep.subr.bf16.mxu0 %v3941_v58  ;;  %v3975_v58 = vld [vmem:[#allocation3 + $0x128] ss:$16 sps:$4 sm:$0xff]  }
  0xc0   : > { %1578 = vmatpush1.bf16.msra.mxu1 %v3972_v55 }
  0xc1   : > { %1539 = vmatpush1.bf16.msra.mxu0 %v3939_v59  ;;  %1579 = vmatprep.subr.bf16.mxu1 %v3977_v56 }
  0xc2   : > { %1540 = vmatprep.subr.bf16.mxu0 %v3944_v60  ;;  %v3980_v60 = vld [vmem:[#allocation3 + $0x14c] ss:$16 sps:$4 sm:$0xff]  }
  0xc4   : > { %1580 = vmatpush1.bf16.msra.mxu1 %v3975_v58 }
  0xc5   : > { %1541 = vmatpush1.bf16.msra.mxu0 %v3942_v61  ;;  %v3978_v61 = vld [vmem:[#allocation3 + $0x148] ss:$16 sps:$4 sm:$0xff]   ;;  %1581 = vmatprep.subr.bf16.mxu1 %v3980_v60 }
  0xc6   : > { %1542 = vmatprep.subr.bf16.mxu0 %v3947_v62  ;;  %v3983_v62 = vld [vmem:[#allocation3 + $0x16c] ss:$16 sps:$4 sm:$0xff]  }
  0xc8   : > { %1582 = vmatpush1.bf16.msra.mxu1 %v3978_v61 }
  0xc9   : > { %1543 = vmatpush1.bf16.msra.mxu0 %v3945_v63  ;;  %1583 = vmatprep.subr.bf16.mxu1 %v3983_v62 }
  0xca   : > { %3601 = vmatprep.subr.bf16.mxu0 %v4251_v4 }
  0xcc   : > { %1553 = vmatmul.mubr.bf16.vlgmr.msra.gmra.mrb[8].mxu0 %v4725_v3  ;;  %1584 = vmatpush1.bf16.msra.mxu1 %v3981_v0 }
  0xcd   : > { %3603 = vmatprep.mubr.msk.bf16.mxu0 %vm4252_vm1, %v4251_v4  ;;  %3607 = vmatprep.subr.bf16.mxu1 %v4251_v4 }
  0xcf   : > { %1594 = vmatmul.mubr.bf16.vlgmr.msra.gmra.mrb[8].mxu1 %v4725_v3 }
  0xd0   : > { %3609 = vmatprep.mubr.msk.bf16.mxu1 %vm4252_vm1, %v4251_v4 }
 0x13f   : > { %v808_v5 = vpop.f32.mrb[0].mxu0 }
 0x140   : > { %v810_v6 = vpop.f32.mrb[1].mxu0  ;;  %v1602_v20 = vpack.c.bf16 %v808_v5, %v808_v5 }
 0x141   : > { %v812_v7 = vpop.f32.mrb[2].mxu0  ;;  %v4740_v21 = vpack.c.bf16 %v810_v6, %v810_v6 }
 0x142   : > { %v813_v8 = vpop.f32.mrb[3].mxu0  ;;  %v849_v9 = vpop.f32.mrb[0].mxu1 }
 0x143   : > { %v851_v10 = vpop.f32.mrb[1].mxu1  ;;  %v4745_v22 = vpack.c.bf16 %v849_v9, %v849_v9 }
 0x144   : > { %v853_v11 = vpop.f32.mrb[2].mxu1  ;;  %v4748_v23 = vpack.c.bf16 %v851_v10, %v851_v10 }
 0x145   : > { %v854_v12 = vpop.f32.mrb[3].mxu1 }
 0x146   : > { %v481_v12 = vld [vmem:[%s467_s26] sm:$0xff]  ;;  %s3121_s26 = scalar_lea.sflag [#allocation8], %s4862_s25 }
 0x16f   : > { %v1181_v13 = vpop.f32.mrb[4].mxu0 }
 0x170   : > { %v1606_v14 = vpack.c.bf16 %v1181_v13, %v1181_v13  ;;  %v1183_v15 = vpop.f32.mrb[5].mxu0 }
 0x171   : > { %v4733_v16 = vpack.c.bf16 %v1183_v15, %v1183_v15  ;;  %v1185_v17 = vpop.f32.mrb[6].mxu0 }
 0x172   : > { %v1618_v18 = vsel %vm770_vm0, %v1606_v14, 0  ;;  %1729 = vrot.lane.b32.xlu0 %v1606_v14, %s4253_s16  ;;  %v1186_v19 = vpop.f32.mrb[7].mxu0  ;;  %v1222_v24 = vpop.f32.mrb[4].mxu1 }
 0x173   : > { %3602 = vmatpush3.bf16.xpose.msra.mxu0 %v1618_v18  ;;  %1973 = vrot.lane.b32.xlu1 %v4733_v16, %s4253_s16  ;;  %v4754_v25 = vpack.c.bf16 %v1222_v24, %v1222_v24  ;;  %v1224_v26 = vpop.f32.mrb[5].mxu1  ;;  %v1859_v53 = vsel %vm770_vm0, %v4733_v16, 0 }
 0x174   : > { %3613 = vmatprep.subr.bf16.mxu0 %v4251_v4  ;;  %v1226_v27 = vpop.f32.mrb[6].mxu1  ;;  %v4758_v28 = vpack.c.bf16 %v1224_v26, %v1224_v26 }
 0x175   : > { %v1227_v29 = vpop.f32.mrb[7].mxu1  ;;  %v2102_v1 = vsel %vm770_vm0, %v4754_v25, 0 }
 0x176   : > { %1726 = vrot.lane.b32.xlu0 %v1602_v20, %s4253_s16  ;;  %v2345_v3 = vsel %vm770_vm0, %v4758_v28, 0 }
 0x177   : > { %1970 = vrot.lane.b32.xlu1 %v4740_v21, %s4253_s16 }
 0x17a   : > { %3604 = vmatmul.mubr.msk.bf16.vlgmr.msra.gmra.mrb[12].mxu0 %vm770_vm0, %v1602_v20  ;;  %2216 = vrot.lane.b32.xlu0 %v4754_v25, %s4253_s16 }
 0x17b   : > { %2213 = vrot.lane.b32.xlu1 %v4745_v22, %s4253_s16  ;;  %3615 = vmatprep.mubr.msk.bf16.mxu0 %vm4252_vm1, %v4251_v4 }
 0x17e   : > { %2459 = vrot.lane.b32.xlu0 %v4758_v28, %s4253_s16 }
 0x17f   : > { %2456 = vrot.lane.b32.xlu1 %v4748_v23, %s4253_s16 }
 0x19f   : > { %v4764_v30 = vpop.f32.mrb[8].mxu0 }
 0x1a0   : > { %v4766_v31 = vpop.f32.mrb[9].mxu0  ;;  %v4787_v2 = vpack.c.bf16 %v4764_v30, %v4764_v30 }
 0x1a1   : > { %v1558_v32 = vpop.f32.mrb[10].mxu0 }
 0x1a2   : > { %v1559_v33 = vpop.f32.mrb[11].mxu0  ;;  %v1680_v6 = vsel %vm1678_vm2, %v4787_v2, 0 }
 0x1a3   : > { %3608 = vmatpush3.bf16.msra.mxu1 %v1680_v6  ;;  %v4839_v6 = vpop.f32.mrb[8].mxu1 }
 0x1a4   : > { %3619 = vmatprep.subr.bf16.mxu1 %v4251_v4 }
 0x1e4   : > { %v1730_v45 = vpop.permute.xlu0 %1729 }
 0x1e5   : > { %v1735_v47 = vsel %vm770_vm0, %v1730_v45, 0  ;;  %v1974_v57 = vpop.permute.xlu1 %1973 }
 0x1e6   : > { %3614 = vmatpush3.bf16.xpose.msra.mxu0 %v1735_v47  ;;  %v1979_v59 = vsel %vm770_vm0, %v1974_v57, 0 }
 0x1e7   : > { %3625 = vmatprep.subr.bf16.mxu0 %v4251_v4 }
 0x1e8   : > { %v1727_v51 = vpop.permute.xlu0 %1726 }
 0x1e9   : > { %v1971_v63 = vpop.permute.xlu1 %1970 }
 0x1ec   : > { %v2217_v5 = vpop.permute.xlu0 %2216 }
 0x1ed   : > { %3616 = vmatmul.mubr.msk.bf16.vlgmr.msra.gmra.mrb[16].mxu0 %vm770_vm0, %v1727_v51  ;;  %v2222_v7 = vsel %vm770_vm0, %v2217_v5, 0  ;;  %v2214_v8 = vpop.permute.xlu1 %2213 }
 0x1ee   : > { %3626 = vmatpush3.bf16.xpose.msra.mxu0 %v1859_v53  ;;  %3627 = vmatprep.mubr.msk.bf16.mxu0 %vm4252_vm1, %v4251_v4 }
 0x1ef   : > { %3637 = vmatprep.subr.bf16.mxu0 %v4251_v4 }
 0x1f0   : > { %v2460_v9 = vpop.permute.xlu0 %2459 }
 0x1f1   : > { %v2465_v10 = vsel %vm770_vm0, %v2460_v9, 0  ;;  %v2457_v11 = vpop.permute.xlu1 %2456 }
 0x1f5   : > { %3628 = vmatmul.mubr.msk.bf16.vlgmr.msra.gmra.mrb[20].mxu0 %vm770_vm0, %v4740_v21 }
 0x1f6   : > { %3638 = vmatpush3.bf16.xpose.msra.mxu0 %v1979_v59  ;;  %3639 = vmatprep.mubr.msk.bf16.mxu0 %vm4252_vm1, %v4251_v4 }
 0x1f7   : > { %3649 = vmatprep.subr.bf16.mxu0 %v4251_v4 }
 0x1fd   : > { %3640 = vmatmul.mubr.msk.bf16.vlgmr.msra.gmra.mrb[24].mxu0 %vm770_vm0, %v1971_v63 }
 0x1fe   : > { %3650 = vmatpush3.bf16.xpose.msra.mxu0 %v2102_v1  ;;  %3651 = vmatprep.mubr.msk.bf16.mxu0 %vm4252_vm1, %v4251_v4 }
 0x1ff   : > { %3661 = vmatprep.subr.bf16.mxu0 %v4251_v4 }
 0x205   : > { %3652 = vmatmul.mubr.msk.bf16.vlgmr.msra.gmra.mrb[28].mxu0 %vm770_vm0, %v4745_v22 }
 0x206   : > { %3662 = vmatpush3.bf16.xpose.msra.mxu0 %v2222_v7  ;;  %3663 = vmatprep.mubr.msk.bf16.mxu0 %vm4252_vm1, %v4251_v4  ;;  %v4841_v7 = vpop.f32.mrb[9].mxu1 }
 0x207   : > { %3673 = vmatprep.subr.bf16.mxu0 %v4251_v4 }
 0x20d   : > { %3664 = vmatmul.mubr.msk.bf16.vlgmr.msra.gmra.mrb[32].mxu0 %vm770_vm0, %v2214_v8  ;;  %v1599_v8 = vpop.f32.mrb[10].mxu1 }
 0x20e   : > { %3674 = vmatpush3.bf16.xpose.msra.mxu0 %v2345_v3  ;;  %3675 = vmatprep.mubr.msk.bf16.mxu0 %vm4252_vm1, %v4251_v4  ;;  %v1600_v3 = vpop.f32.mrb[11].mxu1 }
 0x20f   : > { %3685 = vmatprep.subr.bf16.mxu0 %v4251_v4 }
 0x215   : > { %3676 = vmatmul.mubr.msk.bf16.vlgmr.msra.gmra.mrb[36].mxu0 %vm770_vm0, %v4748_v23 }
 0x216   : > { %3686 = vmatpush3.bf16.xpose.msra.mxu0 %v2465_v10  ;;  %3687 = vmatprep.mubr.msk.bf16.mxu0 %vm4252_vm1, %v4251_v4 }
 0x21d   : > { %3688 = vmatmul.mubr.msk.bf16.vlgmr.msra.gmra.mrb[40].mxu0 %vm770_vm0, %v2457_v11 }
 0x24d   : > { %v1654_v13 = vpop.f32.mrb[12].mxu0 }
 0x24e   : > { %v1655_v14 = vadd.f32 %v1654_v13, %v481_v12  ;;  %v3605_v15 = vpop.f32.mrb[13].mxu0 }
 0x24f   : > { %v1657_v16 = vpop.f32.mrb[14].mxu0 }
 0x250   : > { %v3606_v17 = vpop.f32.mrb[15].mxu0  ;;  %v1661_v18 = vsel %vm1660_vm3, %v1655_v14, -inf }
 0x251   : > { %1662 = vmax.xlane.f32.xlu0 %v1661_v18 }
 0x2c0   : > { %v1771_v19 = vpop.f32.mrb[16].mxu0 }
 0x2c1   : > { %v1772_v20 = vadd.f32 %v1771_v19, %v481_v12  ;;  %v3617_v21 = vpop.f32.mrb[17].mxu0 }
 0x2c2   : > { %v1774_v22 = vpop.f32.mrb[18].mxu0 }
 0x2c3   : > { %v3618_v23 = vpop.f32.mrb[19].mxu0  ;;  %v1777_v24 = vsel %vm1660_vm3, %v1772_v20, -inf }
 0x2c4   : > { %1778 = vmax.xlane.f32.xlu1 %v1777_v24 }
 0x2c8   : > { %v1895_v25 = vpop.f32.mrb[20].mxu0 }
 0x2c9   : > { %v1896_v26 = vadd.f32 %v1895_v25, %v481_v12  ;;  %v3629_v27 = vpop.f32.mrb[21].mxu0  ;;  %v4857_v25 = vpack.c.bf16 %v4766_v31, %v4766_v31 }
 0x2ca   : > { %v1898_v28 = vpop.f32.mrb[22].mxu0 }
 0x2cb   : > { %v3630_v29 = vpop.f32.mrb[23].mxu0  ;;  %v1901_v30 = vsel %vm1660_vm3, %v1896_v26, -inf }
 0x2cc   : > { %1902 = vmax.xlane.f32.xlu0 %v1901_v30 }
 0x2d0   : > { %v2015_v32 = vpop.f32.mrb[24].mxu0 }
 0x2d1   : > { %v2016_v33 = vadd.f32 %v2015_v32, %v481_v12  ;;  %v3641_v34 = vpop.f32.mrb[25].mxu0 }
 0x2d2   : > { %v2018_v35 = vpop.f32.mrb[26].mxu0 }
 0x2d3   : > { %v3642_v36 = vpop.f32.mrb[27].mxu0  ;;  %v2021_v37 = vsel %vm1660_vm3, %v2016_v33, -inf }
 0x2d4   : > { %2022 = vmax.xlane.f32.xlu0 %v2021_v37 }
 0x2d8   : > { %v2138_v38 = vpop.f32.mrb[28].mxu0 }
 0x2d9   : > { %v4825_v39 = vadd.f32 %v2138_v38, %v481_v12  ;;  %v3653_v40 = vpop.f32.mrb[29].mxu0 }
 0x2da   : > { %v2141_v41 = vpop.f32.mrb[30].mxu0 }
 0x2db   : > { %v3654_v42 = vpop.f32.mrb[31].mxu0  ;;  %v2144_v43 = vsel %vm1660_vm3, %v4825_v39, -inf }
 0x2dc   : > { %2145 = vmax.xlane.f32.xlu1 %v2144_v43 }
 0x2de   : > { %v1663_v44 = vpop.xlane.xlu0 %1662 }
 0x2df   : > { %v1664_v45 = vsub.f32 %v1655_v14, %v1663_v44 }
 0x2e0   : > { %v2258_v46 = vpop.f32.mrb[32].mxu0 }
 0x2e1   : > { %v1665_v47 = vmul.f32 1.442695, %v1664_v45  ;;  %v4829_v48 = vadd.f32 %v2258_v46, %v481_v12  ;;  %v3665_v49 = vpop.f32.mrb[33].mxu0 }
 0x2e2   : > { %v2261_v50 = vpop.f32.mrb[34].mxu0  ;;  %v4896_v49 = vpack.c.bf16 %v4841_v7, %v4841_v7 }
 0x2e3   : > { %4084 = vpow2.f32 %v1665_v47  ;;  %v3666_v51 = vpop.f32.mrb[35].mxu0  ;;  %v2264_v52 = vsel %vm1660_vm3, %v4829_v48, -inf }
 0x2e4   : > { %2265 = vmax.xlane.f32.xlu0 %v2264_v52 }
 0x2e8   : > { %v2381_v53 = vpop.f32.mrb[36].mxu0 }
 0x2e9   : > { %v4833_v54 = vadd.f32 %v2381_v53, %v481_v12  ;;  %v3677_v55 = vpop.f32.mrb[37].mxu0 }
 0x2ea   : > { %v2384_v56 = vpop.f32.mrb[38].mxu0 }
 0x2eb   : > { %v3678_v57 = vpop.f32.mrb[39].mxu0  ;;  %v2387_v58 = vsel %vm1660_vm3, %v4833_v54, -inf }
 0x2ec   : > { %2388 = vmax.xlane.f32.xlu1 %v2387_v58 }
 0x2ed   : > { %v4085_v59 = vpop.eup %4084 }
 0x2ee   : > { %v1667_v60 = vsel %vm1660_vm3, %v4085_v59, 0.0 }
 0x2f0   : > { %1668 = vadd.xlane.f32.xlu1 %v1667_v60  ;;  %v2501_v61 = vpop.f32.mrb[40].mxu0 }
 0x2f1   : > { %v2502_v62 = vadd.f32 %v2501_v61, %v481_v12  ;;  %v3689_v63 = vpop.f32.mrb[41].mxu0  ;;  %v1925_v61 = vsel %vm1678_vm2, %v4857_v25, 0 }
 0x2f2   : > { %v2504_v0 = vpop.f32.mrb[42].mxu0 }
 0x2f3   : > { %v3690_v1 = vpop.f32.mrb[43].mxu0  ;;  %v2507_v5 = vsel %vm1660_vm3, %v2502_v62, -inf }
 0x2f4   : > { %2508 = vmax.xlane.f32.xlu0 %v2507_v5 }
 0x351   : > { %v1779_v9 = vpop.xlane.xlu1 %1778 }
 0x352   : > { %v1780_v10 = vsub.f32 %v1772_v20, %v1779_v9 }
 0x354   : > { %v1781_v11 = vmul.f32 1.442695, %v1780_v10 }
 0x356   : > { %4086 = vpow2.f32 %v1781_v11 }
 0x359   : > { %v1903_v13 = vpop.xlane.xlu0 %1902 }
 0x35a   : > { %v1904_v14 = vsub.f32 %v1896_v26, %v1903_v13 }
 0x35c   : > { %v1905_v15 = vmul.f32 1.442695, %v1904_v14 }
 0x35e   : > { %4088 = vpow2.f32 %v1905_v15 }
 0x360   : > { %v4843_v12 = vpop.eup %4086 }
 0x361   : > { %v2023_v16 = vpop.xlane.xlu0 %2022  ;;  %v1783_v17 = vsel %vm1660_vm3, %v4843_v12, 0.0 }
 0x362   : > { %v2024_v18 = vsub.f32 %v2016_v33, %v2023_v16  ;;  %1784 = vadd.xlane.f32.xlu0 %v1783_v17 }
 0x364   : > { %v2025_v19 = vmul.f32 1.442695, %v2024_v18 }
 0x366   : > { %4090 = vpow2.f32 %v2025_v19 }
 0x368   : > { %v4847_v21 = vpop.eup %4088 }
 0x369   : > { %v1907_v20 = vsel %vm1660_vm3, %v4847_v21, 0.0  ;;  %v2146_v24 = vpop.xlane.xlu1 %2145 }
 0x36a   : > { %1908 = vadd.xlane.f32.xlu1 %v1907_v20  ;;  %v2147_v29 = vsub.f32 %v4825_v39, %v2146_v24 }
 0x36c   : > { %v2148_v33 = vmul.f32 1.442695, %v2147_v29 }
 0x370   : > { %v4851_v22 = vpop.eup %4090 }
 0x371   : > { %v2027_v23 = vsel %vm1660_vm3, %v4851_v22, 0.0  ;;  %v2266_v30 = vpop.xlane.xlu0 %2265 }
 0x372   : > { %2028 = vadd.xlane.f32.xlu0 %v2027_v23  ;;  %v2267_v34 = vsub.f32 %v4829_v48, %v2266_v30  ;;  %v1612_v48 = vpack.c.bf16 %v4839_v6, %v4839_v6  ;;  %v2411_v23 = vsel %vm1678_vm2, %v4896_v49, 0 }
 0x374   : > { %v2268_v36 = vmul.f32 1.442695, %v2267_v34  ;;  %v2168_v6 = vsel %vm1678_vm2, %v1612_v48, 0  ;;  %v3984_v34 = vld [vmem:[%s5244_s7] ss:$8 sps:$4 sm:$0xff]  }
 0x379   : > { %v2389_v26 = vpop.xlane.xlu1 %2388 }
 0x37b   : > { %2042 = vrot.lane.b32.xlu1 %v4857_v25, %s4253_s16 }
 0x37d   : > { %v1669_v27 = vpop.xlane.xlu1 %1668 }
 0x37e   : > { %4092 = vrcp.f32 %v1669_v27 }
 0x37f   : > { %4094 = vpow2.f32 %v2148_v33 }
 0x380   : > { %4096 = vpow2.f32 %v2268_v36  ;;  %v3987_v36 = vld [vmem:[%s5244_s7 + $0x10] ss:$8 sps:$4 sm:$0xff]  }
 0x381   : > { %v2509_v35 = vpop.xlane.xlu0 %2508 }
 0x382   : > { %v2510_v37 = vsub.f32 %v2502_v62, %v2509_v35  ;;  %v3986_v35 = vld [vmem:[%s5244_s7 + $0x4] ss:$8 sps:$4 sm:$0xff]  }
 0x384   : > { %v2511_v39 = vmul.f32 1.442695, %v2510_v37 }
 0x388   : > { %1798 = vrot.lane.b32.xlu0 %v4787_v2, %s4253_s16  ;;  %v4093_v28 = vpop.eup %4092  ;;  %v2390_v2 = vsub.f32 %v4833_v54, %v2389_v26 }
 0x389   : > { %v1671_v32 = vmul.f32 %v4093_v28, %v4085_v59  ;;  %v4876_v40 = vpop.eup %4094 }
 0x38a   : > { %v2391_v38 = vmul.f32 1.442695, %v2390_v2  ;;  %v2150_v41 = vsel %vm1660_vm3, %v4876_v40, 0.0  ;;  %v4880_v42 = vpop.eup %4096  ;;  %v3989_v2 = vld [vmem:[%s5244_s7 + $0x14] ss:$8 sps:$4 sm:$0xff]  }
 0x38b   : > { %v1672_v31 = vpack.c.bf16 %v1671_v32, %v1671_v32  ;;  %v2270_v44 = vsel %vm1660_vm3, %v4880_v42, 0.0 }
 0x38c   : > { %4098 = vpow2.f32 %v2391_v38  ;;  %v3992_v38 = vld [vmem:[%s5244_s7 + $0x24] ss:$8 sps:$4 sm:$0xff]  }
 0x38d   : > { %3610 = vmatmul.mubr.msk.bf16.vlgmr.msra.gmra.mrb[12].mxu1 %vm1660_vm3, %v1672_v31  ;;  %1674 = vst.msk [vmem:[%s4870_s12] sm:$0xf] %vm1673_vm4, %v1672_v31  ;;  %4100 = vpow2.f32 %v2511_v39  ;;  %v3990_v39 = vld [vmem:[%s5244_s7 + $0x20] ss:$8 sps:$4 sm:$0xff]  }
 0x38e   : > { %3621 = vmatprep.mubr.msk.bf16.mxu1 %vm4252_vm1, %v4251_v4 }
 0x396   : > { %v4882_v43 = vpop.eup %4098 }
 0x397   : > { %v4886_v45 = vpop.eup %4100  ;;  %v2393_v46 = vsel %vm1660_vm3, %v4882_v43, 0.0 }
 0x398   : > { %v2513_v47 = vsel %vm1660_vm3, %v4886_v45, 0.0 }
 0x39f   : > { %2151 = vadd.xlane.f32.xlu1 %v2150_v41  ;;  %v3993_v41 = vld [vmem:[%s5244_s7 + $0x30] ss:$8 sps:$4 sm:$0xff]  }
 0x3a3   : > { %2271 = vadd.xlane.f32.xlu1 %v2270_v44  ;;  %v4001_v44 = vld [vmem:[%s5244_s7 + $0x54] ss:$8 sps:$4 sm:$0xff]  }
 0x3a7   : > { %2394 = vadd.xlane.f32.xlu1 %v2393_v46  ;;  %2514 = vadd.xlane.f32.xlu0 %v2513_v47  ;;  %v4004_v46 = vld [vmem:[%s5244_s7 + $0x64] ss:$8 sps:$4 sm:$0xff]   ;;  %v4002_v47 = vld [vmem:[%s5244_s7 + $0x60] ss:$8 sps:$4 sm:$0xff]  }
 0x3b8   : > { %2285 = vrot.lane.b32.xlu1 %v1612_v48, %s4253_s16  ;;  %v4007_v48 = vld [vmem:[%s5244_s7 + $0x74] ss:$8 sps:$4 sm:$0xff]  }
 0x3bc   : > { %2528 = vrot.lane.b32.xlu1 %v4896_v49, %s4253_s16  ;;  %v4005_v49 = vld [vmem:[%s5244_s7 + $0x70] ss:$8 sps:$4 sm:$0xff]  }
 0x3ef   : > { %v1785_v50 = vpop.xlane.xlu0 %1784 }
 0x3f0   : > { %4102 = vrcp.f32 %v1785_v50  ;;  %v4010_v50 = vld [vmem:[%s5244_s7 + $0x84] ss:$8 sps:$4 sm:$0xff]  }
 0x3f7   : > { %v1909_v51 = vpop.xlane.xlu1 %1908 }
 0x3f8   : > { %4104 = vrcp.f32 %v1909_v51  ;;  %v4008_v51 = vld [vmem:[%s5244_s7 + $0x80] ss:$8 sps:$4 sm:$0xff]  }
 0x3fa   : > { %v4103_v52 = vpop.eup %4102 }
 0x3fb   : > { %v1787_v53 = vmul.f32 %v4103_v52, %v4843_v12  ;;  %v2043_v0 = vpop.permute.xlu1 %2042  ;;  %v4013_v52 = vld [vmem:[%s5244_s7 + $0x94] ss:$8 sps:$4 sm:$0xff]  }
 0x3fc   : > { %v2048_v5 = vsel %vm1678_vm2, %v2043_v0, 0 }
 0x3fd   : > { %v1788_v54 = vpack.c.bf16 %v1787_v53, %v1787_v53  ;;  %v4011_v53 = vld [vmem:[%s5244_s7 + $0x90] ss:$8 sps:$4 sm:$0xff]  }
 0x3ff   : > { %1792 = vrot.lane.b32.xlu0 %v1788_v54, %s4254_s29  ;;  %v2029_v55 = vpop.xlane.xlu0 %2028  ;;  %s4261_s29 = smov [#allocation7]  }
 0x400   : > { %4106 = vrcp.f32 %v2029_v55  ;;  %v4014_v55 = vld [vmem:[%s5244_s7 + $0xa0] ss:$8 sps:$4 sm:$0xff]  }
 0x402   : > { %v4105_v56 = vpop.eup %4104 }
 0x403   : > { %v1799_v57 = vpop.permute.xlu0 %1798  ;;  %v1911_v58 = vmul.f32 %v4105_v56, %v4847_v21  ;;  %v4019_v56 = vld [vmem:[%s5244_s7 + $0xb4] ss:$8 sps:$4 sm:$0xff]  }
 0x404   : > { %v1804_v59 = vsel %vm1678_vm2, %v1799_v57, 0  ;;  %v4017_v57 = vld [vmem:[%s5244_s7 + $0xb0] ss:$8 sps:$4 sm:$0xff]  }
 0x405   : > { %3620 = vmatpush3.bf16.msra.mxu1 %v1804_v59  ;;  %v1912_v60 = vpack.c.bf16 %v1911_v58, %v1911_v58  ;;  %v4022_v58 = vld [vmem:[%s5244_s7 + $0xc4] ss:$8 sps:$4 sm:$0xff]   ;;  %v4020_v59 = vld [vmem:[%s5244_s7 + $0xc0] ss:$8 sps:$4 sm:$0xff]  }
 0x406   : > { %3631 = vmatprep.subr.bf16.mxu1 %v4251_v4 }
 0x407   : > { %1916 = vrot.lane.b32.xlu0 %v1912_v60, %s4255_s30  ;;  %s4152_s30 = sshll.u32 %s4261_s29, 4  ;;  %s4153_s30 = int_to_ptr.vmem [resolvable:$false] %s4152_s30 }
 0x408   : > { %3622 = vmatmul.mubr.msk.bf16.vlgmr.msra.gmra.mrb[16].mxu1 %vm1660_vm3, %v1788_v54  ;;  %v4016_v54 = vld [vmem:[%s5244_s7 + $0xa4] ss:$8 sps:$4 sm:$0xff]  }
 0x409   : > { %3632 = vmatpush3.bf16.msra.mxu1 %v1925_v61  ;;  %3633 = vmatprep.mubr.msk.bf16.mxu1 %vm4252_vm1, %v4251_v4 }
 0x40a   : > { %v4107_v62 = vpop.eup %4106  ;;  %3643 = vmatprep.subr.bf16.mxu1 %v4251_v4 }
 0x40b   : > { %v2031_v63 = vmul.f32 %v4107_v62, %v4851_v22 }
 0x40d   : > { %v2032_v1 = vpack.c.bf16 %v2031_v63, %v2031_v63 }
 0x40f   : > { %2036 = vrot.lane.b32.xlu0 %v2032_v1, %s4256_s14  ;;  %s4154_s14 = scalar_lea.vmem %s4153_s30, 128 }
 0x410   : > { %3634 = vmatmul.mubr.msk.bf16.vlgmr.msra.gmra.mrb[20].mxu1 %vm1660_vm3, %v1912_v60 }
 0x411   : > { %3644 = vmatpush3.bf16.msra.mxu1 %v2048_v5  ;;  %3645 = vmatprep.mubr.msk.bf16.mxu1 %vm4252_vm1, %v4251_v4  ;;  %v4023_v5 = vld [vmem:[%s5244_s7 + $0xd0] ss:$8 sps:$4 sm:$0xff]  }
 0x412   : > { %3655 = vmatprep.subr.bf16.mxu1 %v4251_v4 }
 0x418   : > { %3646 = vmatmul.mubr.msk.bf16.vlgmr.msra.gmra.mrb[24].mxu1 %vm1660_vm3, %v2032_v1  ;;  %v4025_v1 = vld [vmem:[%s5244_s7 + $0xd4] ss:$8 sps:$4 sm:$0xff]  }
 0x419   : > { %3656 = vmatpush3.bf16.msra.mxu1 %v2168_v6  ;;  %3657 = vmatprep.mubr.msk.bf16.mxu1 %vm4252_vm1, %v4251_v4  ;;  %v4028_v6 = vld [vmem:[%s5244_s7 + $0xe4] ss:$8 sps:$4 sm:$0xff]  }
 0x41a   : > { %3667 = vmatprep.subr.bf16.mxu1 %v4251_v4 }
 0x42c   : > { %v2152_v7 = vpop.xlane.xlu1 %2151 }
 0x42d   : > { %4108 = vrcp.f32 %v2152_v7  ;;  %v4026_v7 = vld [vmem:[%s5244_s7 + $0xe0] ss:$8 sps:$4 sm:$0xff]  }
 0x430   : > { %v2272_v8 = vpop.xlane.xlu1 %2271 }
 0x431   : > { %4110 = vrcp.f32 %v2272_v8  ;;  %v4032_v8 = vld [vmem:[%s5244_s7 + $0x100] ss:$8 sps:$4 sm:$0xff]  }
 0x434   : > { %v2395_v3 = vpop.xlane.xlu1 %2394  ;;  %v2515_v9 = vpop.xlane.xlu0 %2514 }
 0x435   : > { %4112 = vrcp.f32 %v2395_v3  ;;  %v4034_v3 = vld [vmem:[%s5244_s7 + $0x104] ss:$8 sps:$4 sm:$0xff]  }
 0x436   : > { %4114 = vrcp.f32 %v2515_v9  ;;  %3025 = vmatprep.subr.bf16.mxu0 %v4034_v3 }
 0x437   : > { %v4109_v10 = vpop.eup %4108  ;;  %3026 = vmatpush1.bf16.msra.mxu0 %v4032_v8 }
 0x438   : > { %v2154_v11 = vmul.f32 %v4109_v10, %v4876_v40  ;;  %v2286_v13 = vpop.permute.xlu1 %2285  ;;  %v3995_v40 = vld [vmem:[%s5244_s7 + $0x34] ss:$8 sps:$4 sm:$0xff]  }
 0x439   : > { %v2291_v14 = vsel %vm1678_vm2, %v2286_v13, 0  ;;  %v4031_v10 = vld [vmem:[%s5244_s7 + $0xf4] ss:$8 sps:$4 sm:$0xff]  }
 0x43a   : > { %v2155_v15 = vpack.c.bf16 %v2154_v11, %v2154_v11 }
 0x43b   : > { %v4111_v12 = vpop.eup %4110 }
 0x43c   : > { %2159 = vrot.lane.b32.xlu0 %v2155_v15, %s4257_s0  ;;  %3658 = vmatmul.mubr.msk.bf16.vlgmr.msra.gmra.mrb[28].mxu1 %vm1660_vm3, %v2155_v15  ;;  %v2274_v16 = vmul.f32 %v4111_v12, %v4880_v42  ;;  %v2529_v25 = vpop.permute.xlu1 %2528  ;;  %v3998_v42 = vld [vmem:[%s5244_s7 + $0x44] ss:$8 sps:$4 sm:$0xff]   ;;  %v4029_v12 = vld [vmem:[%s5244_s7 + $0xf0] ss:$8 sps:$4 sm:$0xff]  }
 0x43d   : > { %3668 = vmatpush3.bf16.msra.mxu1 %v2291_v14  ;;  %3669 = vmatprep.mubr.msk.bf16.mxu1 %vm4252_vm1, %v4251_v4  ;;  %v2534_v26 = vsel %vm1678_vm2, %v2529_v25, 0  ;;  %v4040_v25 = vld [vmem:[%s5244_s7 + $0x120] ss:$8 sps:$4 sm:$0xff]  }
 0x43e   : > { %3679 = vmatprep.subr.bf16.mxu1 %v4251_v4  ;;  %v4930_v20 = vpack.c.bf16 %v2274_v16, %v2274_v16 }
 0x43f   : > { %v4113_v17 = vpop.eup %4112 }
 0x440   : > { %v4115_v18 = vpop.eup %4114  ;;  %v2397_v19 = vmul.f32 %v4113_v17, %v4882_v43  ;;  %v3996_v43 = vld [vmem:[%s5244_s7 + $0x40] ss:$8 sps:$4 sm:$0xff]   ;;  %v4039_v17 = vld [vmem:[%s5244_s7 + $0x114] ss:$8 sps:$4 sm:$0xff]  }
 0x441   : > { %v2517_v22 = vmul.f32 %v4115_v18, %v4886_v45  ;;  %v3999_v45 = vld [vmem:[%s5244_s7 + $0x50] ss:$8 sps:$4 sm:$0xff]   ;;  %3027 = vmatprep.subr.bf16.mxu0 %v4039_v17 }
 0x442   : > { %v2398_v21 = vpack.c.bf16 %v2397_v19, %v2397_v19 }
 0x443   : > { %v2518_v24 = vpack.c.bf16 %v2517_v22, %v2517_v22 }
 0x444   : > { %2402 = vrot.lane.b32.xlu0 %v2398_v21, %s4258_s15  ;;  %3670 = vmatmul.mubr.msk.bf16.vlgmr.msra.gmra.mrb[32].mxu1 %vm1660_vm3, %v4930_v20  ;;  %s3148_s15 = sshll.u32 %s4870_s12, 4  ;;  %s3149_s15 = int_to_ptr.vmem [resolvable:$true] %s3148_s15 }
 0x445   : > { %3680 = vmatpush3.bf16.msra.mxu1 %v2411_v23  ;;  %3681 = vmatprep.mubr.msk.bf16.mxu1 %vm4252_vm1, %v4251_v4  ;;  %v4042_v23 = vld [vmem:[%s5244_s7 + $0x124] ss:$8 sps:$4 sm:$0xff]   ;;  %s4148_s13 = scalar_lea.vmem %s3149_s15, 64  ;;  %p4155_p2 = scmp.lt.s32.totalorder %s3149_s15, %s4153_s30 }
 0x446   : > { %3691 = vmatprep.subr.bf16.mxu1 %v4251_v4  ;;  %p4149_p6 = scmp.ne.s32.totalorder %s3149_s15, %s4148_s13  ;;  %p4156_p3 = scmp.lt.s32.totalorder %s4154_s14, %s4148_s13 }
 0x448   : > { %2522 = vrot.lane.b32.xlu0 %v2518_v24, %s4259_s24  ;;  %p4150_p10 = pnand %p4149_p6, %p5266_p9  ;;  %p4157_p4 = por %p4156_p3, %p4155_p2 }
 0x44a   : > { %p4151_p12 = pneg %p4150_p10 }
 0x44c   : > { %3682 = vmatmul.mubr.msk.bf16.vlgmr.msra.gmra.mrb[36].mxu1 %vm1660_vm3, %v2398_v21  ;;  %v4037_v21 = vld [vmem:[%s5244_s7 + $0x110] ss:$8 sps:$4 sm:$0xff]   ;;  %p4158_p7 = pnand %p4157_p4, %p4151_p12 }
 0x44d   : > { %3692 = vmatpush3.bf16.msra.mxu1 %v2534_v26  ;;  %3693 = vmatprep.mubr.msk.bf16.mxu1 %vm4252_vm1, %v4251_v4  ;;  %v4045_v26 = vld [vmem:[%s5244_s7 + $0x134] ss:$8 sps:$4 sm:$0xff]  }
 0x44e   : > { %2984 = vmatprep.subr.bf16.mxu1 %v3986_v35  ;;  %3028 = vmatpush1.bf16.msra.mxu0 %v4037_v21  ;;  %v4060_v35 = vld [vmem:[%s5244_s7 + $0x184] ss:$8 sps:$4 sm:$0xff]  }
 0x44f   : > { %3029 = vmatprep.subr.bf16.mxu0 %v4042_v23  ;;  %v4118_v23 = vld [vmem:[%s4468_s19] sm:$0xff] }
 0x452   : > { %3030 = vmatpush1.bf16.msra.mxu0 %v4040_v25  ;;  %v4119_v25 = vld [vmem:[%s4468_s19 + $0x8] sm:$0xff]  ;;  %s3551_s19 = sshll.u32 %s4344_s21, 6 }
 0x453   : > { %3031 = vmatprep.subr.bf16.mxu0 %v4045_v26  ;;  %s5162_s6 = scalar_lea.hbm %s5248_s11, %s3551_s19 }
 0x454   : > { %3694 = vmatmul.mubr.msk.bf16.vlgmr.msra.gmra.mrb[40].mxu1 %vm1660_vm3, %v2518_v24 }
 0x455   : > { %2985 = vmatpush1.bf16.msra.mxu1 %v3984_v34  ;;  %v4055_v34 = vld [vmem:[%s5244_s7 + $0x170] ss:$8 sps:$4 sm:$0xff]  }
 0x456   : > { %2986 = vmatprep.subr.bf16.mxu1 %v3989_v2  ;;  %v4058_v2 = vld [vmem:[%s5244_s7 + $0x180] ss:$8 sps:$4 sm:$0xff]  }
 0x459   : > { %2987 = vmatpush1.bf16.msra.mxu1 %v3987_v36  ;;  %v4063_v36 = vld [vmem:[%s5244_s7 + $0x194] ss:$8 sps:$4 sm:$0xff]  }
 0x45a   : > { %2988 = vmatprep.subr.bf16.mxu1 %v3992_v38  ;;  %v4066_v38 = vld [vmem:[%s5244_s7 + $0x1a4] ss:$8 sps:$4 sm:$0xff]  }
 0x45d   : > { %2989 = vmatpush1.bf16.msra.mxu1 %v3990_v39  ;;  %v4064_v39 = vld [vmem:[%s5244_s7 + $0x1a0] ss:$8 sps:$4 sm:$0xff]  }
 0x45e   : > { %2990 = vmatprep.subr.bf16.mxu1 %v3995_v40 }
 0x460   : > { %v1716_v27 = vpop.f32.mrb[12].mxu1 }
 0x461   : > { %v1722_v28 = vpack.c.bf16 %v1716_v27, %v1716_v27  ;;  %v3611_v29 = vpop.f32.mrb[13].mxu1  ;;  %2991 = vmatpush1.bf16.msra.mxu1 %v3993_v41  ;;  %v4043_v27 = vld [vmem:[%s5244_s7 + $0x130] ss:$8 sps:$4 sm:$0xff]   ;;  %v4069_v41 = vld [vmem:[%s5244_s7 + $0x1b4] ss:$8 sps:$4 sm:$0xff]  }
 0x462   : > { %v1719_v30 = vpop.f32.mrb[14].mxu1  ;;  %2992 = vmatprep.subr.bf16.mxu1 %v3998_v42  ;;  %3032 = vmatpush1.bf16.msra.mxu0 %v4043_v27  ;;  %v4046_v29 = vld [vmem:[%s5244_s7 + $0x140] ss:$8 sps:$4 sm:$0xff]  }
 0x463   : > { %1724 = vst.msk [vmem:[#allocation2] sm:$0xf] %vm1723_vm5, %v1722_v28  ;;  %v3612_v32 = vpop.f32.mrb[15].mxu1  ;;  %v4048_v28 = vld [vmem:[%s5244_s7 + $0x144] ss:$8 sps:$4 sm:$0xff]  }
 0x464   : > { %3033 = vmatprep.subr.bf16.mxu0 %v4048_v28  ;;  %v4051_v30 = vld [vmem:[%s5244_s7 + $0x154] ss:$8 sps:$4 sm:$0xff]   ;;  %v4049_v32 = vld [vmem:[%s5244_s7 + $0x150] ss:$8 sps:$4 sm:$0xff]  }
 0x465   : > { %2993 = vmatpush1.bf16.msra.mxu1 %v3996_v43 }
 0x466   : > { %2994 = vmatprep.subr.bf16.mxu1 %v4001_v44  ;;  %3034 = vmatpush1.bf16.msra.mxu0 %v4046_v29 }
 0x467   : > { %3035 = vmatprep.subr.bf16.mxu0 %v4051_v30 }
 0x469   : > { %2995 = vmatpush1.bf16.msra.mxu1 %v3999_v45 }
 0x46a   : > { %2996 = vmatprep.subr.bf16.mxu1 %v4004_v46  ;;  %3036 = vmatpush1.bf16.msra.mxu0 %v4049_v32  ;;  %v4067_v46 = vld [vmem:[%s5244_s7 + $0x1b0] ss:$8 sps:$4 sm:$0xff]  }
 0x46d   : > { %2997 = vmatpush1.bf16.msra.mxu1 %v4002_v47  ;;  %v4072_v47 = vld [vmem:[%s5244_s7 + $0x1c4] ss:$8 sps:$4 sm:$0xff]  }
 0x46e   : > { %2998 = vmatprep.subr.bf16.mxu1 %v4007_v48  ;;  %v4070_v48 = vld [vmem:[%s5244_s7 + $0x1c0] ss:$8 sps:$4 sm:$0xff]  }
 0x471   : > { %v1793_v31 = vpop.permute.xlu0 %1792  ;;  %2999 = vmatpush1.bf16.msra.mxu1 %v4005_v49 }
 0x472   : > { %1796 = vst.msk [vmem:[%s4870_s12] sm:$0xf] %vm1795_vm6, %v1793_v31  ;;  %3000 = vmatprep.subr.bf16.mxu1 %v4010_v50  ;;  %v4054_v31 = vld [vmem:[%s5244_s7 + $0x164] ss:$8 sps:$4 sm:$0xff]   ;;  %v4075_v50 = vld [vmem:[%s5244_s7 + $0x1d4] ss:$8 sps:$4 sm:$0xff]  }
 0x473   : > { %3037 = vmatprep.subr.bf16.mxu0 %v4054_v31 }
 0x475   : > { %3001 = vmatpush1.bf16.msra.mxu1 %v4008_v51 }
 0x476   : > { %3002 = vmatprep.subr.bf16.mxu1 %v4013_v52 }
 0x479   : > { %v1917_v33 = vpop.permute.xlu0 %1916  ;;  %3003 = vmatpush1.bf16.msra.mxu1 %v4011_v53 }
 0x47a   : > { %1920 = vst.msk [vmem:[%s4870_s12] sm:$0xf] %vm1919_vm7, %v1917_v33  ;;  %3004 = vmatprep.subr.bf16.mxu1 %v4016_v54  ;;  %v4052_v33 = vld [vmem:[%s5244_s7 + $0x160] ss:$8 sps:$4 sm:$0xff]  }
 0x47b   : > { %3038 = vmatpush1.bf16.msra.mxu0 %v4052_v33 }
 0x47d   : > { %3005 = vmatpush1.bf16.msra.mxu1 %v4014_v55  ;;  %v4073_v55 = vld [vmem:[%s5244_s7 + $0x1d0] ss:$8 sps:$4 sm:$0xff]  }
 0x47e   : > { %3006 = vmatprep.subr.bf16.mxu1 %v4019_v56  ;;  %v4078_v56 = vld [vmem:[%s5244_s7 + $0x1e4] ss:$8 sps:$4 sm:$0xff]  }
 0x481   : > { %v2037_v4 = vpop.permute.xlu0 %2036  ;;  %3007 = vmatpush1.bf16.msra.mxu1 %v4017_v57  ;;  %v4076_v57 = vld [vmem:[%s5244_s7 + $0x1e0] ss:$8 sps:$4 sm:$0xff]  }
 0x482   : > { %2040 = vst.msk [vmem:[%s4870_s12] sm:$0xf] %vm2039_vm8, %v2037_v4  ;;  %3008 = vmatprep.subr.bf16.mxu1 %v4022_v58  ;;  %v4057_v4 = vld [vmem:[%s5244_s7 + $0x174] ss:$8 sps:$4 sm:$0xff]  }
 0x483   : > { %3039 = vmatprep.subr.bf16.mxu0 %v4057_v4 }
 0x484   : > { %3040 = vmatpush1.bf16.msra.mxu0 %v4055_v34 }
 0x485   : > { %3009 = vmatpush1.bf16.msra.mxu1 %v4020_v59  ;;  %3041 = vmatprep.subr.bf16.mxu0 %v4060_v35  ;;  %v4081_v59 = vld [vmem:[%s5244_s7 + $0x1f4] ss:$8 sps:$4 sm:$0xff]  }
 0x486   : > { %3010 = vmatprep.subr.bf16.mxu1 %v4025_v1 }
 0x488   : > { %3042 = vmatpush1.bf16.msra.mxu0 %v4058_v2 }
 0x489   : > { %3011 = vmatpush1.bf16.msra.mxu1 %v4023_v5  ;;  %3043 = vmatprep.subr.bf16.mxu0 %v4063_v36 }
 0x48a   : > { %3012 = vmatprep.subr.bf16.mxu1 %v4028_v6 }
 0x48d   : > { %3013 = vmatpush1.bf16.msra.mxu1 %v4026_v7 }
 0x48e   : > { %3014 = vmatprep.subr.bf16.mxu1 %v4031_v10 }
 0x491   : > { %3015 = vmatpush1.bf16.msra.mxu1 %v4029_v12 }
 0x4ae   : > { %v2160_v37 = vpop.permute.xlu0 %2159 }
 0x4af   : > { %2163 = vst.msk [vmem:[%s4870_s12] sm:$0xf] %vm2162_vm9, %v2160_v37  ;;  %v4061_v37 = vld [vmem:[%s5244_s7 + $0x190] ss:$8 sps:$4 sm:$0xff]  }
 0x4b0   : > { %3044 = vmatpush1.bf16.msra.mxu0 %v4061_v37 }
 0x4b1   : > { %3045 = vmatprep.subr.bf16.mxu0 %v4066_v38 }
 0x4b4   : > { %3046 = vmatpush1.bf16.msra.mxu0 %v4064_v39 }
 0x4b5   : > { %3047 = vmatprep.subr.bf16.mxu0 %v4069_v41 }
 0x4b6   : > { %v2403_v34 = vpop.permute.xlu0 %2402 }
 0x4b8   : > { %3048 = vmatpush1.bf16.msra.mxu0 %v4067_v46 }
 0x4b9   : > { %3049 = vmatprep.subr.bf16.mxu0 %v4072_v47 }
 0x4ba   : > { %v2523_v41 = vpop.permute.xlu0 %2522 }
 0x4bc   : > { %3050 = vmatpush1.bf16.msra.mxu0 %v4070_v48 }
 0x4bd   : > { %3051 = vmatprep.subr.bf16.mxu0 %v4075_v50 }
 0x4c0   : > { %3052 = vmatpush1.bf16.msra.mxu0 %v4073_v55 }
 0x4c1   : > { %3053 = vmatprep.subr.bf16.mxu0 %v4078_v56 }
 0x4c4   : > { %3054 = vmatpush1.bf16.msra.mxu0 %v4076_v57 }
 0x4c5   : > { %3055 = vmatprep.subr.bf16.mxu0 %v4081_v59 }
 0x4db   : > { %v1840_v60 = vpop.f32.mrb[16].mxu1 }
 0x4dc   : > { %v3558_v61 = vpack.c.bf16 %v1840_v60, %v1840_v60  ;;  %v3623_v62 = vpop.f32.mrb[17].mxu1 }
 0x4dd   : > { %v1843_v63 = vpop.f32.mrb[18].mxu1 }
 0x4de   : > { %1850 = vrot.lane.b32.xlu1 %v3558_v61, %s4253_s16  ;;  %v3624_v0 = vpop.f32.mrb[19].mxu1 }
 0x4df   : > { %v4079_v0 = vld [vmem:[%s5244_s7 + $0x1f0] ss:$8 sps:$4 sm:$0xff]  }
 0x4e0   : > { %3056 = vmatpush1.bf16.msra.mxu0 %v4079_v0 }
 0x4e3   : > { %v1961_v9 = vpop.f32.mrb[20].mxu1 }
 0x4e4   : > { %v1967_v11 = vpack.c.bf16 %v1961_v9, %v1961_v9  ;;  %v3635_v13 = vpop.f32.mrb[21].mxu1 }
 0x4e5   : > { %v1964_v14 = vpop.f32.mrb[22].mxu1 }
 0x4e6   : > { %1968 = vst.msk [vmem:[#allocation2 + $0x4] sm:$0xf] %vm1723_vm5, %v1967_v11  ;;  %v3636_v15 = vpop.f32.mrb[23].mxu1 }
 0x4eb   : > { %v2084_v16 = vpop.f32.mrb[24].mxu1 }
 0x4ec   : > { %v3561_v18 = vpack.c.bf16 %v2084_v16, %v2084_v16  ;;  %v3647_v19 = vpop.f32.mrb[25].mxu1 }
 0x4ed   : > { %v2087_v22 = vpop.f32.mrb[26].mxu1 }
 0x4ee   : > { %2094 = vrot.lane.b32.xlu1 %v3561_v18, %s4253_s16  ;;  %v3648_v24 = vpop.f32.mrb[27].mxu1 }
 0x50f   : > { %v2204_v40 = vpop.f32.mrb[28].mxu1 }
 0x510   : > { %v2210_v42 = vpack.c.bf16 %v2204_v40, %v2204_v40  ;;  %v3659_v43 = vpop.f32.mrb[29].mxu1 }
 0x511   : > { %v2207_v44 = vpop.f32.mrb[30].mxu1 }
 0x512   : > { %2211 = vst.msk [vmem:[#allocation2 + $0x8] sm:$0xf] %vm1723_vm5, %v2210_v42  ;;  %v3660_v45 = vpop.f32.mrb[31].mxu1 }
 0x517   : > { %v2327_v49 = vpop.f32.mrb[32].mxu1 }
 0x518   : > { %v3564_v51 = vpack.c.bf16 %v2327_v49, %v2327_v49  ;;  %v3671_v52 = vpop.f32.mrb[33].mxu1 }
 0x519   : > { %v2330_v53 = vpop.f32.mrb[34].mxu1 }
 0x51a   : > { %2337 = vrot.lane.b32.xlu1 %v3564_v51, %s4253_s16  ;;  %v3672_v54 = vpop.f32.mrb[35].mxu1 }
 0x51f   : > { %v2447_v58 = vpop.f32.mrb[36].mxu1 }
 0x520   : > { %v2453_v60 = vpack.c.bf16 %v2447_v58, %v2447_v58  ;;  %v3683_v61 = vpop.f32.mrb[37].mxu1 }
 0x521   : > { %v2450_v62 = vpop.f32.mrb[38].mxu1 }
 0x522   : > { %2454 = vst.msk [vmem:[#allocation2 + $0xc] sm:$0xf] %vm1723_vm5, %v2453_v60  ;;  %v3684_v63 = vpop.f32.mrb[39].mxu1 }
 0x527   : > { %v2570_v1 = vpop.f32.mrb[40].mxu1 }
 0x528   : > { %v3567_v5 = vpack.c.bf16 %v2570_v1, %v2570_v1  ;;  %v3695_v6 = vpop.f32.mrb[41].mxu1 }
 0x529   : > { %v2573_v7 = vpop.f32.mrb[42].mxu1 }
 0x52a   : > { %2580 = vrot.lane.b32.xlu1 %v3567_v5, %s4253_s16  ;;  %v3696_v8 = vpop.f32.mrb[43].mxu1  ;;  %s4260_s16 = smov 40  }
 0x550   : > { %v1851_v3 = vpop.permute.xlu1 %1850 }
 0x551   : > { %1854 = vst.msk [vmem:[#allocation2] sm:$0xf] %vm1853_vm10, %v1851_v3 }
 0x560   : > { %v2095_v9 = vpop.permute.xlu1 %2094 }
 0x561   : > { %2097 = vst.msk [vmem:[#allocation2 + $0x4] sm:$0xf] %vm1853_vm10, %v2095_v9 }
 0x568   : > { %v2584_v10 = vld [vmem:[#allocation2] sm:$0xff] }
 0x569   : > { %v3479_v11 = vcombine.low %v2584_v10, %v2584_v10  ;;  %v3480_v13 = vcombine.high %v2584_v10, %v2584_v10 }
 0x56b   : > { %3016 = vmatprep.mubr.bf16.mxu1 %v3480_v13 }
 0x56c   : > { %3017 = vmatmul.mubr.bf16.vlgmr.msra.gmra.mrb[44].mxu1 %v3479_v11 }
 0x58c   : > { %v2338_v14 = vpop.permute.xlu1 %2337 }
 0x58d   : > { %2340 = vst.msk [vmem:[#allocation2 + $0x8] sm:$0xf] %vm1853_vm10, %v2338_v14 }
 0x59c   : > { %v2581_v15 = vpop.permute.xlu1 %2580 }
 0x59d   : > { %2583 = vst.msk [vmem:[#allocation2 + $0xc] sm:$0xf] %vm1853_vm10, %v2581_v15 }
 0x5a4   : > { %v2585_v12 = vld [vmem:[#allocation2 + $0x8] sm:$0xff] }
 0x5a5   : > { %v3481_v16 = vcombine.low %v2585_v12, %v2585_v12  ;;  %v3482_v17 = vcombine.high %v2585_v12, %v2585_v12 }
 0x5a7   : > { %3057 = vmatprep.mubr.bf16.mxu0 %v3482_v17 }
 0x5a8   : > { %3058 = vmatmul.mubr.bf16.vlgmr.msra.gmra.mrb[44].mxu0 %v3481_v16 }
 0x63f   : > { %v3018_v18 = vpop.f32.mrb[44].mxu1 }
 0x640   : > { %v3020_v19 = vpop.f32.mrb[45].mxu1  ;;  %v3019_v24 = vadd.f32 %v4118_v23, %v3018_v18 }
 0x641   : > { %v3022_v21 = vpop.f32.mrb[46].mxu1  ;;  %v3021_v26 = vadd.f32 %v4119_v25, %v3020_v19 }
 0x642   : > { %v3023_v22 = vpop.f32.mrb[47].mxu1 }
 0x67b   : > { %v3059_v27 = vpop.f32.mrb[44].mxu0 }
 0x67c   : > { %v3060_v28 = vadd.f32 %v3059_v27, %v3019_v24  ;;  %v3061_v29 = vpop.f32.mrb[45].mxu0 }
 0x67d   : > { %v3062_v30 = vadd.f32 %v3061_v29, %v3021_v26  ;;  %v3063_v32 = vpop.f32.mrb[46].mxu0 }
 0x67e   : > { %v3064_v31 = vpop.f32.mrb[47].mxu0 }
 0x67f   : > { %v3066_v33 = vsel %vm770_vm0, %v3062_v30, 0.0 }
 0x680   : > { %v3067_v4 = vadd.f32 %v3066_v33, %v3060_v28 }
 0x682   : > { %3068 = vadd.xlane.f32.xlu1 %v3067_v4 }
 0x693   : > { %2279 = vrot.lane.b32.xlu1 %v4930_v20, %s4260_s16 }
 0x70f   : > { %v3069_v35 = vpop.xlane.xlu1 %3068 }
 0x710   : > { %v3071_v2 = vmul.f32 0.0052083335, %v3069_v35 }
 0x712   : > { %v3072_v36 = vsub.f32 %v3060_v28, %v3071_v2  ;;  %v3073_v37 = vsub.f32 %v3062_v30, %v3071_v2 }
 0x713   : > { %v2280_v38 = vpop.permute.xlu1 %2279 }
 0x714   : > { %2283 = vst.msk [vmem:[%s4870_s12] sm:$0xf] %vm2282_vm11, %v2280_v38  ;;  %v3074_v39 = vmul.f32 %v3072_v36, %v3072_v36  ;;  %v3075_v40 = vmul.f32 %v3073_v37, %v3073_v37 }
 0x715   : > { %2406 = vst.msk [vmem:[%s4870_s12] sm:$0xf] %vm2405_vm12, %v2403_v34 }
 0x716   : > { %v3076_v20 = vsel %vm770_vm0, %v3075_v40, 0.0  ;;  %2526 = vst.msk [vmem:[%s4870_s12] sm:$0xf] %vm2525_vm13, %v2523_v41 }
 0x717   : > { %v3077_v42 = vadd.f32 %v3076_v20, %v3074_v39 }
 0x719   : > { %3078 = vadd.xlane.f32.xlu0 %v3077_v42 }
 0x71a   : > { %4161 = shalt.err (!%p4158_p7)
}
 0x71b   : > { %s4162_s12 = scalar_lea.hbm %s5162_s6, 64  ;;  %s4166_s19 = scalar_lea.hbm %s5248_s11, 128 }
 0x71c   : > { %p4163_p8 = scmp.ne.s32.totalorder %s5162_s6, %s4162_s12  ;;  %p4167_p1 = scmp.lt.u32.totalorder %s5162_s6, %s5248_s11 }
 0x71d   : > { %p4168_p0 = scmp.lt.u32.totalorder %s4166_s19, %s4162_s12  ;;  %p4170_p6 = scmp.lt.u32.totalorder %s4162_s12, %s5162_s6 }
 0x71e   : > { %p4164_p11 = pnand %p4163_p8, %p5266_p9 }
 0x71f   : > { %p4169_p5 = por %p4168_p0, %p4167_p1 }
 0x720   : > { %p4165_p13 = pneg %p4164_p11 }
 0x721   : > { %p4171_p10 = por %p4170_p6, %p4169_p5 }
 0x723   : > { %p4172_p12 = pnand %p4171_p10, %p4165_p13 }
 0x725   : > { %4175 = shalt.err (!%p4172_p12)
}
 0x726   : > { %3706 = dma.vmem_to_hbm [thread:$0]  (%p5266_p9), %s3149_s15, 64, %s5162_s6, %s3121_s26   ;;  %v3087_v45 = vlaneseq  ;;  %v3085_v50 = vld [vmem:[%s5245_s8] sm:$0x3] }
 0x727   : > { %s3293_s30 = sshll.u32 %s4862_s25, 4  ;;  %v3099_v51 = vld [vmem:[%s5246_s9] sm:$0x3]  ;;  %s3568_s15 = sshll.u32 %s4344_s21, 8 }
 0x728   : > { %v3088_v47 = vshrl.u32 %v3087_v45, 7  ;;  %s441_s6 = scalar_lea.vmem [#allocation6], %s3293_s30  ;;  %s5193_s19 = scalar_lea.hbm %s5247_s10, %s3568_s15 }
 0x729   : > { %s3135_s26 = sshll.u32 %s441_s6, 4  ;;  %s3116_s21 = scalar_lea.sflag [#allocation5], %s4862_s25  ;;  %s5195_s26 = int_to_ptr.vmem [resolvable:$true] %s3135_s26 }
 0x72a   : > { %v3089_v48 = vsub.s32 0, %v3088_v47  ;;  %v3093_v49 = vsub.s32 1, %v3088_v47  ;;  %s4176_s24 = scalar_lea.vmem %s5195_s26, 256  ;;  %s4262_s22 = smov [#allocation6]  }
 0x72b   : > { %p4177_p2 = scmp.ne.s32.totalorder %s5195_s26, %s4176_s24  ;;  %s4180_s13 = sshll.u32 %s4262_s22, 4  ;;  %s4181_s13 = int_to_ptr.vmem [resolvable:$false] %s4180_s13 }
 0x72c   : > { %v3090_v52 = vrot.slane %v3085_v50, %v3089_v48  ;;  %v3094_v53 = vrot.slane %v3085_v50, %v3093_v49  ;;  %v3108_v55 = vrot.slane %v3099_v51, %v3093_v49  ;;  %v3104_v58 = vrot.slane %v3099_v51, %v3089_v48  ;;  %s4182_s29 = scalar_lea.vmem %s4181_s13, 512  ;;  %p4183_p7 = scmp.lt.s32.totalorder %s5195_s26, %s4181_s13 }
 0x72d   : > { %p4178_p3 = pnand %p4177_p2, %p5266_p9  ;;  %p4184_p8 = scmp.lt.s32.totalorder %s4182_s29, %s4176_s24 }
 0x72f   : > { %p4179_p4 = pneg %p4178_p3  ;;  %p4185_p11 = por %p4184_p8, %p4183_p7 }
 0x731   : > { %p4186_p13 = pnand %p4185_p11, %p4179_p4 }
 0x7a6   : > { %v3079_v43 = vpop.xlane.xlu0 %3078 }
 0x7a7   : > { %v3080_v44 = vmul.f32 0.0052083335, %v3079_v43 }
 0x7a9   : > { %v3081_v46 = vadd.f32 1e-05, %v3080_v44 }
 0x7ab   : > { %4116 = vrsqrt.f32 %v3081_v46 }
 0x7b5   : > { %v4117_v54 = vpop.eup %4116 }
 0x7b6   : > { %v3083_v56 = vmul.f32 %v4117_v54, %v3072_v36  ;;  %v3084_v57 = vmul.f32 %v4117_v54, %v3073_v37 }
 0x7b8   : > { %v3097_v59 = vmul.f32 %v3090_v52, %v3083_v56  ;;  %v3098_v60 = vmul.f32 %v3094_v53, %v3084_v57 }
 0x7ba   : > { %v3112_v61 = vadd.f32 %v3108_v55, %v3098_v60  ;;  %v3111_v62 = vadd.f32 %v3104_v58, %v3097_v59 }
 0x7bc   : > { %3113 = vst [vmem:[%s441_s6] sm:$0xff] %v3111_v62  ;;  %3114 = vst.msk [vmem:[%s441_s6 + $0x8] sm:$0xff] %vm770_vm0, %v3112_v61 }
 0x7bd   : > { %4189 = shalt.err (!%p4186_p13)
}
 0x7be   : > { %s4190_s25 = scalar_lea.hbm %s5193_s19, 256  ;;  %s4194_s12 = scalar_lea.hbm %s5247_s10, 512 }
 0x7bf   : > { %p4191_p1 = scmp.ne.s32.totalorder %s5193_s19, %s4190_s25  ;;  %p4195_p6 = scmp.lt.u32.totalorder %s5193_s19, %s5247_s10 }
 0x7c0   : > { %p4196_p10 = scmp.lt.u32.totalorder %s4194_s12, %s4190_s25  ;;  %p4198_p2 = scmp.lt.u32.totalorder %s4190_s25, %s5193_s19 }
 0x7c1   : > { %p4192_p0 = pnand %p4191_p1, %p5266_p9 }
 0x7c2   : > { %p4197_p12 = por %p4196_p10, %p4195_p6 }
 0x7c3   : > { %p4193_p5 = pneg %p4192_p0 }
 0x7c4   : > { %p4199_p3 = por %p4198_p2, %p4197_p12 }
 0x7c6   : > { %p4200_p4 = pnand %p4199_p3, %p4193_p5 }
 0x7c8   : > { %4203 = shalt.err (!%p4200_p4)
}
 0x7c9   : > { %3705 = dma.vmem_to_hbm [thread:$0]  (%p5266_p9), %s5195_s26, 256, %s5193_s19, %s3116_s21  }
 0x7ca PF: > { %p3722_p7 = scmp.ge.s32.totalorder %s4246_s20, 2  ;;  %s3160_s0 = sand.u32 1, %s4234_s17  }
 0x7cb   : > { %p5267_p8 = scmp.ne.s32.totalorder %s5258_s28, 0  ;;  %s3161_s16 = scalar_lea.sflag [#allocation5], %s3160_s0 }
 0x7cd   : > { %p3714_p11 = pnand %p3722_p7, %p5267_p8 }
 0x7cf   : > { %4225 = dma.done.wait (!%p3714_p11), %s3161_s16, 256  }
 0x7d0   : > { %4227 = vsyncadd (!%p3714_p11), %s3161_s16, 4294967040  ;;  %s3170_s24 = scalar_lea.sflag [#allocation8], %s3160_s0 }
 0x7d1   : > { %4229 = dma.done.wait (!%p3714_p11), %s3170_s24, 64  }
 0x7d2   : > { %4231 = vsyncadd (!%p3714_p11), %s3170_s24, 4294967232  ;;  %s5268_s27 = sld [smem:[#allocation12_spill]]  ;;  %s5269_s19 = sld [smem:[#allocation13_spill]] }
 0x7d3   : > { %p26_p9 = scmp.ge.s32.totalorder %s4348_s23, 4   ;;  %s5270_s17 = smov %s4238_s18 }
 0x7d4   : > { %s5272_s20 = smov %s4348_s23 }
 0x7d5   :  { %28 = sbr.rel (!%p26_p9) target bundleno = 9 (0x9), region = 126 }
 0x7d8   : > { %s5271_s18 = smov %s5268_s27 }
 0x7dc   :  { %3175 = vsyncpa [#allocation4], 1 }
 0x7dd   :  { %3177 = vsyncpa [#allocation4 + $0x1], 1 }
 0x7de   :  { %3178 = vsyncpa [#allocation5], 1 }
 0x7df   :  { %3180 = vsyncpa [#allocation5 + $0x1], 1 }
 0x7e0   :  { %3181 = vsyncpa [#allocation8], 1 }
 0x7e1   :  { %3183 = vsyncpa [#allocation8 + $0x1], 1 }

</bundles_post_ra>
